<compile_context>
chip_gen: v7x
topology: tpu7x:2x2x1
jax: 0.10.0
libtpu: 0.0.40
codegen_flags: <defaults>
</compile_context>

<pallas_src>
import functools
import math

import jax
import jax.numpy as jnp
from jax import lax
from jax.experimental import pallas as pl
from jax.experimental.pallas import tpu as pltpu

LOG_2PI = math.log(2.0 * math.pi)

# Fixed (non-learnable) prior hyper-parameters from __init__.
PRIOR_PI = (0.75, 0.25)
PRIOR_SIGMA = (math.exp(-2.0), math.exp(-6.0))
LOG_PRIOR_PI = (math.log(PRIOR_PI[0]), math.log(PRIOR_PI[1]))

# Trace-time folded constants for the scale-mixture prior:
#   log pi_i - 0.5*log(2*pi) - log(sigma_i)   and   -0.5 / sigma_i^2
_PRIOR_C = tuple(LOG_PRIOR_PI[i] - 0.5 * LOG_2PI - math.log(PRIOR_SIGMA[i])
                 for i in range(2))
_PRIOR_K = tuple(-0.5 / (PRIOR_SIGMA[i] ** 2) for i in range(2))

LANE = 128
SUBLANE = 8
MAX_TILE = 512   # per-tile f32 footprint 1 MiB -> ~13 MiB double-buffered total


def _round_up(n, m):
    return ((n + m - 1) // m) * m


def _pick_tile(dim_pad, max_tile=MAX_TILE):
    """Largest multiple of 128 that divides dim_pad and is <= max_tile."""
    t = min(max_tile, dim_pad)
    while dim_pad % t:
        t -= LANE
    return t


def _prior_logpdf(v):
    """Scale-mixture-of-Gaussians prior, log-space, folded constants."""
    v2 = v * v
    return jnp.logaddexp(_PRIOR_C[0] + _PRIOR_K[0] * v2,
                         _PRIOR_C[1] + _PRIOR_K[1] * v2)


def _gauss_logpdf(x, mu, sigma, *, approx_rcp):
    """Gaussian log-density; approx_rcp=True uses the EUP approx reciprocal."""
    inv = pl.reciprocal(sigma, approx=True) if approx_rcp else 1.0 / sigma
    z = (x - mu) * inv
    return -0.5 * LOG_2PI - jnp.log(sigma) - 0.5 * z * z


# ----------------------------------------------------------------------------
# Gridded fused kernel: affine transform (MXU, accumulated over K) plus
# log-prior / log-variational-posterior partial sums (per-N-block output).
# ----------------------------------------------------------------------------
def _fused_kernel(logpi_ref,                       # scalar-prefetch (SMEM) (2,)
                  x_ref, wt_ref, w_ref, b_ref,
                  mu1_ref, rho1_ref, mu2_ref, rho2_ref,
                  bmu_ref, brho_ref,
                  out_ref, part_ref, *,
                  tn, tk, n_has_pad, k_has_pad, valid_out_last, valid_in_last):
    n = pl.program_id(0)
    k = pl.program_id(1)
    nn = pl.num_programs(0)
    nk = pl.num_programs(1)

    # ---- affine transform: (B_pad, TK) @ (TK, TN), accumulated across K. ----
    @pl.when(k == 0)
    def _():
        # Bias row (padded lanes are zero) seeds the resident accumulator.
        out_ref[...] = jnp.broadcast_to(b_ref[...], out_ref.shape)

    out_ref[...] += jnp.dot(x_ref[...], wt_ref[...],
                            preferred_element_type=jnp.float32)

    # ---- helper: accumulate the two scalar partial sums (lane-dense). ----
    def acc_partials(lp_part, lq_part):
        sub = lax.broadcasted_iota(jnp.int32, part_ref.shape, 1)
        part_ref[...] += jnp.where(sub == 0, lp_part, lq_part)

    # ---- bias densities: once per N block (at k == 0), plus partial init. ----
    @pl.when(k == 0)
    def _():
        part_ref[...] = jnp.zeros_like(part_ref)
        b = b_ref[...]                                   # (1, tn)
        bsig = jax.nn.softplus(brho_ref[...])
        lp_b = _prior_logpdf(b)
        lq_b = _gauss_logpdf(b, bmu_ref[...], bsig, approx_rcp=True)
        if n_has_pad:
            lim = jnp.where(n == nn - 1, valid_out_last, tn)
            bm = lax.broadcasted_iota(jnp.int32, b.shape, 1) < lim
            lp_b = jnp.where(bm, lp_b, 0.0)
            lq_b = jnp.where(bm, lq_b, 0.0)
        acc_partials(jnp.sum(lp_b), jnp.sum(lq_b))

    # ---- weight densities (heavy part): natural-layout (tn, tk) tile. ----
    w = w_ref[...]
    sig1 = jax.nn.softplus(rho1_ref[...])
    sig2 = jax.nn.softplus(rho2_ref[...])
    lq1 = logpi_ref[0] + _gauss_logpdf(w, mu1_ref[...], sig1, approx_rcp=True)
    lq2 = logpi_ref[1] + _gauss_logpdf(w, mu2_ref[...], sig2, approx_rcp=True)
    lq_tile = jnp.logaddexp(lq1, lq2)
    lp_tile = _prior_logpdf(w)

    if not (n_has_pad or k_has_pad):
        acc_partials(jnp.sum(lp_tile), jnp.sum(lq_tile))
    else:
        conds = []
        if n_has_pad:
            conds.append(n == nn - 1)
        if k_has_pad:
            conds.append(k == nk - 1)
        is_edge = conds[0] if len(conds) == 1 else jnp.logical_or(*conds)

        @pl.when(is_edge)          # edge tiles: masked sums
        def _():
            mask = None
            if n_has_pad:
                rlim = jnp.where(n == nn - 1, valid_out_last, tn)
                mask = lax.broadcasted_iota(jnp.int32, (tn, tk), 0) < rlim
            if k_has_pad:
                clim = jnp.where(k == nk - 1, valid_in_last, tk)
                cmask = lax.broadcasted_iota(jnp.int32, (tn, tk), 1) < clim
                mask = cmask if mask is None else (mask & cmask)
            acc_partials(jnp.sum(jnp.where(mask, lp_tile, 0.0)),
                         jnp.sum(jnp.where(mask, lq_tile, 0.0)))

        @pl.when(jnp.logical_not(is_edge))   # interior tiles: unmasked sums
        def _():
            acc_partials(jnp.sum(lp_tile), jnp.sum(lq_tile))


# ----------------------------------------------------------------------------
# Wrapper: mirrors BayesianLayer.forward given pre-sampled weights/bias and
# the variational-posterior parameters.
# ----------------------------------------------------------------------------
def bayesian_layer_forward(x, weights, bias, mu1, rho1, mu2, rho2, post_pi,
                           b_mu, b_rho):
    f32 = jnp.float32
    B, In = x.shape
    Out = weights.shape[0]

    B_pad = _round_up(B, SUBLANE)
    In_pad = _round_up(In, LANE)
    Out_pad = _round_up(Out, LANE)

    def pad2(a, r_pad, c_pad):
        a = a.astype(f32)
        r, c = a.shape
        if r == r_pad and c == c_pad:      # skip pad copy when aligned
            return a
        return jnp.pad(a, ((0, r_pad - r), (0, c_pad - c)))

    def pad_row(v):
        v = v.astype(f32).reshape(1, -1)
        if v.shape[1] == Out_pad:
            return v
        return jnp.pad(v, ((0, 0), (0, Out_pad - v.shape[1])))

    x_p = pad2(x, B_pad, In_pad)
    w_nat = pad2(weights, Out_pad, In_pad)     # natural layout (density math)
    wt_p = pad2(weights.T, In_pad, Out_pad)    # transposed copy (matmul only)
    mu1_p, rho1_p = pad2(mu1, Out_pad, In_pad), pad2(rho1, Out_pad, In_pad)
    mu2_p, rho2_p = pad2(mu2, Out_pad, In_pad), pad2(rho2, Out_pad, In_pad)
    b_p, bmu_p, brho_p = pad_row(bias), pad_row(b_mu), pad_row(b_rho)
    log_pi = jnp.log(post_pi.astype(f32))      # (2,) learnable mixture weights

    TN = _pick_tile(Out_pad)
    TK = _pick_tile(In_pad)
    grid_n = Out_pad // TN
    grid_k = In_pad // TK

    n_has_pad = Out_pad != Out
    k_has_pad = In_pad != In
    valid_out_last = Out - (grid_n - 1) * TN
    valid_in_last = In - (grid_k - 1) * TK

    kernel = functools.partial(
        _fused_kernel, tn=TN, tk=TK,
        n_has_pad=n_has_pad, k_has_pad=k_has_pad,
        valid_out_last=valid_out_last, valid_in_last=valid_in_last)

    wspec = pl.BlockSpec((TN, TK), lambda n, k, pi: (n, k))     # natural layout
    rowspec = pl.BlockSpec((1, TN), lambda n, k, pi: (0, n))    # bias-shaped rows

    out_p, partials = pl.pallas_call(
        kernel,
        grid_spec=pltpu.PrefetchScalarGridSpec(
            num_scalar_prefetch=1,
            grid=(grid_n, grid_k),                 # reduction (K) axis last
            in_specs=[
                pl.BlockSpec((B_pad, TK), lambda n, k, pi: (0, k)),   # x
                pl.BlockSpec((TK, TN), lambda n, k, pi: (k, n)),      # weights^T
                wspec,                                                # weights
                rowspec,                                              # bias
                wspec, wspec, wspec, wspec,                # mu1, rho1, mu2, rho2
                rowspec, rowspec,                          # b_mu, b_rho
            ],
            out_specs=(
                pl.BlockSpec((B_pad, TN), lambda n, k, pi: (0, n)),   # output
                pl.BlockSpec((1, 2, LANE), lambda n, k, pi: (n, 0, 0)),  # partials
            ),
        ),
        out_shape=(jax.ShapeDtypeStruct((B_pad, Out_pad), f32),
                   jax.ShapeDtypeStruct((grid_n, 2, LANE), f32)),
        compiler_params=pltpu.CompilerParams(
            dimension_semantics=("parallel", "arbitrary"),
            vmem_limit_bytes=48 * 1024 * 1024),
    )(log_pi, x_p, wt_p, w_nat, b_p, mu1_p, rho1_p, mu2_p, rho2_p, bmu_p, brho_p)

    log_prior = jnp.sum(partials[:, 0, 0])
    log_q = jnp.sum(partials[:, 1, 0])
    out = out_p if (B_pad == B and Out_pad == Out) else out_p[:B, :Out]
    return out, log_prior, log_q


# ----------------------------------------------------------------------------
# Pure-JAX reference (same math, unpadded, exact divides) for correctness.
# ----------------------------------------------------------------------------
def _reference_forward(x, weights, bias, mu1, rho1, mu2, rho2, post_pi,
                       b_mu, b_rho):
    out = jnp.dot(x, weights.T, precision=lax.Precision.HIGHEST) + bias
    lp = jnp.sum(_prior_logpdf(weights)) + jnp.sum(_prior_logpdf(bias))
    s1, s2 = jax.nn.softplus(rho1), jax.nn.softplus(rho2)
    lq = jnp.sum(jnp.logaddexp(
        jnp.log(post_pi[0]) + _gauss_logpdf(weights, mu1, s1, approx_rcp=False),
        jnp.log(post_pi[1]) + _gauss_logpdf(weights, mu2, s2, approx_rcp=False)))
    lq = lq + jnp.sum(_gauss_logpdf(bias, b_mu, jax.nn.softplus(b_rho),
                                    approx_rcp=False))
    return out, lp, lq


if __name__ == "__main__":
    in_features, out_features, batch = 32, 16, 8

    key = jax.random.PRNGKey(0)
    k_x, k_rho1, k_rho2, k_comp, k_eps_w, k_eps_b = jax.random.split(key, 6)

    x = jax.random.normal(k_x, (batch, in_features), jnp.float32)

    # Deterministic parameter init matching __init__:
    #   init_rho[i] = log(exp(prior_sigma[i]) - 1)
    init_rho = [math.log(math.exp(s) - 1.0) for s in PRIOR_SIGMA]
    mu1 = jnp.zeros((out_features, in_features), jnp.float32)
    mu2 = jnp.zeros((out_features, in_features), jnp.float32)
    rho1 = init_rho[0] / 2.0 + 0.5 * jax.random.normal(
        k_rho1, (out_features, in_features), jnp.float32)
    rho2 = init_rho[1] / 2.0 + 0.5 * jax.random.normal(
        k_rho2, (out_features, in_features), jnp.float32)
    post_pi = jnp.array([0.5, 0.5], jnp.float32)    # learnable mixture weights
    b_mu = jnp.zeros((out_features,), jnp.float32)
    b_rho = jnp.full((out_features,), -3.0, jnp.float32)

    # --- sample weights from the mixture variational posterior (reparam trick)
    # Kept in wrapper glue (jax.random) rather than pltpu.prng_* so the draws
    # keep jax.random semantics; samples one component per matrix (see TODO).
    comp = jax.random.categorical(k_comp, jnp.log(post_pi))
    mu_sel = jnp.where(comp == 0, mu1, mu2)
    sig_sel = jnp.where(comp == 0, jax.nn.softplus(rho1), jax.nn.softplus(rho2))
    eps_w = jax.random.normal(k_eps_w, (out_features, in_features), jnp.float32)
    weights = jnp.nan_to_num(mu_sel + sig_sel * eps_w)

    # --- sample bias from its diagonal Gaussian posterior
    eps_b = jax.random.normal(k_eps_b, (out_features,), jnp.float32)
    bias = jnp.nan_to_num(b_mu + jax.nn.softplus(b_rho) * eps_b)

    out, log_prior, log_var_post = bayesian_layer_forward(
        x, weights, bias, mu1, rho1, mu2, rho2, post_pi, b_mu, b_rho)
    jax.block_until_ready((out, log_prior, log_var_post))

    assert out.shape == (batch, out_features) and out.dtype == jnp.float32
    assert log_prior.shape == () and log_var_post.shape == ()

    ref_out, ref_lp, ref_lq = _reference_forward(
        x, weights, bias, mu1, rho1, mu2, rho2, post_pi, b_mu, b_rho)
    assert jnp.allclose(out, ref_out, atol=1e-4, rtol=1e-4)
    assert jnp.allclose(log_prior, ref_lp, atol=1e-2, rtol=1e-4)
    # log_q uses pl.reciprocal(approx=True) in-kernel -> loose tolerance.
    assert jnp.allclose(log_var_post, ref_lq, atol=5e-1, rtol=1e-3)

    print("KERNEL_OK")
</pallas_src>

<mosaic_0001>
module attributes {stable_mosaic.version = 11 : i64} {
  func.func @_fused_kernel(%arg0: i32, %arg1: i32, %arg2: memref<2xf32, #tpu.memory_space<smem>>, %arg3: memref<8x128xf32, #tpu.memory_space<vmem>>, %arg4: memref<128x128xf32, #tpu.memory_space<vmem>>, %arg5: memref<128x128xf32, #tpu.memory_space<vmem>>, %arg6: memref<1x128xf32, #tpu.memory_space<vmem>>, %arg7: memref<128x128xf32, #tpu.memory_space<vmem>>, %arg8: memref<128x128xf32, #tpu.memory_space<vmem>>, %arg9: memref<128x128xf32, #tpu.memory_space<vmem>>, %arg10: memref<128x128xf32, #tpu.memory_space<vmem>>, %arg11: memref<1x128xf32, #tpu.memory_space<vmem>>, %arg12: memref<1x128xf32, #tpu.memory_space<vmem>>, %arg13: memref<8x128xf32, #tpu.memory_space<vmem>>, %arg14: memref<1x2x128xf32, #tpu.memory_space<vmem>>) attributes {dimension_semantics = [#tpu.dimension_semantics<parallel>, #tpu.dimension_semantics<arbitrary>], iteration_bounds = array<i64: 1, 1>, scalar_prefetch = 1 : i64, scratch_operands = 0 : i64, tpu.core_type = #tpu.core_type<tc>, window_params = [{transform_indices = @transform_0, window_bounds = array<i64: 8, 128>}, {transform_indices = @transform_1, window_bounds = array<i64: 128, 128>}, {transform_indices = @transform_2, window_bounds = array<i64: 128, 128>}, {transform_indices = @transform_3, window_bounds = array<i64: 1, 128>}, {transform_indices = @transform_4, window_bounds = array<i64: 128, 128>}, {transform_indices = @transform_5, window_bounds = array<i64: 128, 128>}, {transform_indices = @transform_6, window_bounds = array<i64: 128, 128>}, {transform_indices = @transform_7, window_bounds = array<i64: 128, 128>}, {transform_indices = @transform_8, window_bounds = array<i64: 1, 128>}, {transform_indices = @transform_9, window_bounds = array<i64: 1, 128>}, {transform_indices = @transform_10, window_bounds = array<i64: 8, 128>}, {transform_indices = @transform_11, window_bounds = array<i64: 1, 2, 128>}]} {
    %c0_i32 = arith.constant 0 : i32
    %0 = arith.cmpi eq, %arg1, %c0_i32 : i32
    %1 = arith.extui %0 : i1 to i32
    %c0_i32_0 = arith.constant 0 : i32
    %2 = arith.cmpi ne, %1, %c0_i32_0 : i32
    scf.if %2 {
      %c0_39 = arith.constant 0 : index
      %c0_40 = arith.constant 0 : index
      %110 = vector.load %arg6[%c0_39, %c0_40] : memref<1x128xf32, #tpu.memory_space<vmem>>, vector<1x128xf32>
      %111 = vector.shape_cast %110 : vector<1x128xf32> to vector<1x128xf32>
      %112 = vector.broadcast %111 : vector<1x128xf32> to vector<8x128xf32>
      %c0_41 = arith.constant 0 : index
      %c0_42 = arith.constant 0 : index
      %113 = vector.load %arg13[%c0_41, %c0_42] : memref<8x128xf32, #tpu.memory_space<vmem>>, vector<8x128xf32>
      tpu.vector_store %arg13[%c0_41, %c0_42], %112 {strides = array<i32>} : memref<8x128xf32, #tpu.memory_space<vmem>>, vector<8x128xf32>,
    } else {
    }
    %c0 = arith.constant 0 : index
    %c0_1 = arith.constant 0 : index
    %3 = vector.load %arg13[%c0, %c0_1] : memref<8x128xf32, #tpu.memory_space<vmem>>, vector<8x128xf32>
    %c0_2 = arith.constant 0 : index
    %c0_3 = arith.constant 0 : index
    %4 = vector.load %arg3[%c0_2, %c0_3] : memref<8x128xf32, #tpu.memory_space<vmem>>, vector<8x128xf32>
    %c0_4 = arith.constant 0 : index
    %c0_5 = arith.constant 0 : index
    %5 = vector.load %arg4[%c0_4, %c0_5] : memref<128x128xf32, #tpu.memory_space<vmem>>, vector<128x128xf32>
    %cst = arith.constant dense<0.000000e+00> : vector<8x128xf32>
    %6 = tpu.matmul %4, %5, %cst {dimension_numbers = #tpu.dot_dimension_numbers<[1], [0], [0], [1], [0, 0, 1, 1], [], []>} : vector<8x128xf32>, vector<128x128xf32>, vector<8x128xf32> -> vector<8x128xf32>
    %7 = arith.addf %3, %6 : vector<8x128xf32>
    %c0_6 = arith.constant 0 : index
    %c0_7 = arith.constant 0 : index
    %8 = vector.load %arg13[%c0_6, %c0_7] : memref<8x128xf32, #tpu.memory_space<vmem>>, vector<8x128xf32>
    tpu.vector_store %arg13[%c0_6, %c0_7], %7 {strides = array<i32>} : memref<8x128xf32, #tpu.memory_space<vmem>>, vector<8x128xf32>,
    %c0_i32_8 = arith.constant 0 : i32
    %9 = arith.cmpi eq, %arg1, %c0_i32_8 : i32
    %10 = arith.extui %9 : i1 to i32
    %c0_i32_9 = arith.constant 0 : i32
    %11 = arith.cmpi ne, %10, %c0_i32_9 : i32
    scf.if %11 {
      %cst_39 = arith.constant 0.000000e+00 : f32
      %110 = vector.broadcast %cst_39 : f32 to vector<1x2x128xf32>
      %c0_40 = arith.constant 0 : index
      %c0_41 = arith.constant 0 : index
      %c0_42 = arith.constant 0 : index
      %111 = vector.load %arg14[%c0_40, %c0_41, %c0_42] : memref<1x2x128xf32, #tpu.memory_space<vmem>>, vector<1x2x128xf32>
      tpu.vector_store %arg14[%c0_40, %c0_41, %c0_42], %110 {strides = array<i32>} : memref<1x2x128xf32, #tpu.memory_space<vmem>>, vector<1x2x128xf32>,
      %c0_43 = arith.constant 0 : index
      %c0_44 = arith.constant 0 : index
      %112 = vector.load %arg6[%c0_43, %c0_44] : memref<1x128xf32, #tpu.memory_space<vmem>>, vector<1x128xf32>
      %c0_45 = arith.constant 0 : index
      %c0_46 = arith.constant 0 : index
      %113 = vector.load %arg12[%c0_45, %c0_46] : memref<1x128xf32, #tpu.memory_space<vmem>>, vector<1x128xf32>
      %cst_47 = arith.constant 0.000000e+00 : f32
      %114 = vector.broadcast %cst_47 : f32 to vector<1x128xf32>
      %115 = arith.maximumf %113, %114 : vector<1x128xf32>
      %116 = vector.broadcast %cst_47 : f32 to vector<1x128xf32>
      %117 = arith.subf %113, %116 : vector<1x128xf32>
      %118 = arith.cmpf one, %117, %117 : vector<1x128xf32>
      %119 = vector.broadcast %cst_47 : f32 to vector<1x128xf32>
      %120 = arith.addf %113, %119 : vector<1x128xf32>
      %121 = math.absf %117 : vector<1x128xf32>
      %cst_48 = arith.constant 0.000000e+00 : f32
      %122 = vector.broadcast %cst_48 : f32 to vector<1x128xf32>
      %123 = arith.subf %122, %121 : vector<1x128xf32>
      %124 = math.exp %123 : vector<1x128xf32>
      %125 = math.log1p %124 : vector<1x128xf32>
      %126 = arith.addf %115, %125 : vector<1x128xf32>
      %127 = arith.select %118, %120, %126 : vector<1x128xi1>, vector<1x128xf32>
      %128 = arith.mulf %112, %112 : vector<1x128xf32>
      %cst_49 = arith.constant -27.2990742 : f32
      %129 = vector.broadcast %cst_49 : f32 to vector<1x128xf32>
      %130 = arith.mulf %129, %128 : vector<1x128xf32>
      %cst_50 = arith.constant 0.793379366 : f32
      %131 = vector.broadcast %cst_50 : f32 to vector<1x128xf32>
      %132 = arith.addf %131, %130 : vector<1x128xf32>
      %cst_51 = arith.constant -81377.3984 : f32
      %133 = vector.broadcast %cst_51 : f32 to vector<1x128xf32>
      %134 = arith.mulf %133, %128 : vector<1x128xf32>
      %cst_52 = arith.constant 3.694767 : f32
      %135 = vector.broadcast %cst_52 : f32 to vector<1x128xf32>
      %136 = arith.addf %135, %134 : vector<1x128xf32>
      %137 = arith.maximumf %132, %136 : vector<1x128xf32>
      %138 = arith.subf %132, %136 : vector<1x128xf32>
      %139 = arith.cmpf one, %138, %138 : vector<1x128xf32>
      %140 = arith.addf %132, %136 : vector<1x128xf32>
      %141 = math.absf %138 : vector<1x128xf32>
      %cst_53 = arith.constant 0.000000e+00 : f32
      %142 = vector.broadcast %cst_53 : f32 to vector<1x128xf32>
      %143 = arith.subf %142, %141 : vector<1x128xf32>
      %144 = math.exp %143 : vector<1x128xf32>
      %145 = math.log1p %144 : vector<1x128xf32>
      %146 = arith.addf %137, %145 : vector<1x128xf32>
      %147 = arith.select %139, %140, %146 : vector<1x128xi1>, vector<1x128xf32>
      %c0_54 = arith.constant 0 : index
      %c0_55 = arith.constant 0 : index
      %148 = vector.load %arg11[%c0_54, %c0_55] : memref<1x128xf32, #tpu.memory_space<vmem>>, vector<1x128xf32>
      %149 = tpu.reciprocal %127 {approx = true} : vector<1x128xf32> -> vector<1x128xf32>
      %150 = arith.subf %112, %148 : vector<1x128xf32>
      %151 = arith.mulf %150, %149 : vector<1x128xf32>
      %152 = math.log %127 : vector<1x128xf32>
      %cst_56 = arith.constant -0.918938517 : f32
      %153 = vector.broadcast %cst_56 : f32 to vector<1x128xf32>
      %154 = arith.subf %153, %152 : vector<1x128xf32>
      %cst_57 = arith.constant 5.000000e-01 : f32
      %155 = vector.broadcast %cst_57 : f32 to vector<1x128xf32>
      %156 = arith.mulf %155, %151 : vector<1x128xf32>
      %157 = arith.mulf %156, %151 : vector<1x128xf32>
      %158 = arith.subf %154, %157 : vector<1x128xf32>
      %c0_i32_58 = arith.constant 0 : i32
      %159 = arith.cmpi eq, %arg0, %c0_i32_58 : i32
      %c16_i32 = arith.constant 16 : i32
      %c128_i32 = arith.constant 128 : i32
      %160 = arith.select %159, %c16_i32, %c128_i32 : i32
      %161 = tpu.iota {dimensions = array<i32: 1>} : vector<1x128xi32>
      %162 = vector.broadcast %160 : i32 to vector<1x128xi32>
      %163 = arith.cmpi slt, %161, %162 : vector<1x128xi32>
      %cst_59 = arith.constant 0.000000e+00 : f32
      %164 = vector.broadcast %cst_59 : f32 to vector<1x128xf32>
      %165 = arith.select %163, %147, %164 : vector<1x128xi1>, vector<1x128xf32>
      %cst_60 = arith.constant 0.000000e+00 : f32
      %166 = vector.broadcast %cst_60 : f32 to vector<1x128xf32>
      %167 = arith.select %163, %158, %166 : vector<1x128xi1>, vector<1x128xf32>
      %168 = vector.shape_cast %165 : vector<1x128xf32> to vector<1x1x128xf32>
      %cst_61 = arith.constant dense<0.000000e+00> : vector<1xf32>
      %169 = vector.multi_reduction <add>, %168, %cst_61 [1, 2] : vector<1x1x128xf32> to vector<1xf32>
      %170 = vector.shape_cast %169 : vector<1xf32> to vector<1x1x1xf32>
      %171 = vector.extract %170[0, 0, 0] : f32 from vector<1x1x1xf32>
      %172 = vector.shape_cast %167 : vector<1x128xf32> to vector<1x1x128xf32>
      %cst_62 = arith.constant dense<0.000000e+00> : vector<1xf32>
      %173 = vector.multi_reduction <add>, %172, %cst_62 [1, 2] : vector<1x1x128xf32> to vector<1xf32>
      %174 = vector.shape_cast %173 : vector<1xf32> to vector<1x1x1xf32>
      %175 = vector.extract %174[0, 0, 0] : f32 from vector<1x1x1xf32>
      %176 = tpu.iota {dimensions = array<i32: 1>} : vector<1x2x128xi32>
      %c0_63 = arith.constant 0 : index
      %c0_64 = arith.constant 0 : index
      %c0_65 = arith.constant 0 : index
      %177 = vector.load %arg14[%c0_63, %c0_64, %c0_65] : memref<1x2x128xf32, #tpu.memory_space<vmem>>, vector<1x2x128xf32>
      %c0_i32_66 = arith.constant 0 : i32
      %178 = vector.broadcast %c0_i32_66 : i32 to vector<1x2x128xi32>
      %179 = arith.cmpi eq, %176, %178 : vector<1x2x128xi32>
      %180 = vector.broadcast %171 : f32 to vector<1x2x128xf32>
      %181 = vector.broadcast %175 : f32 to vector<1x2x128xf32>
      %182 = arith.select %179, %180, %181 : vector<1x2x128xi1>, vector<1x2x128xf32>
      %183 = arith.addf %177, %182 : vector<1x2x128xf32>
      %c0_67 = arith.constant 0 : index
      %c0_68 = arith.constant 0 : index
      %c0_69 = arith.constant 0 : index
      %184 = vector.load %arg14[%c0_67, %c0_68, %c0_69] : memref<1x2x128xf32, #tpu.memory_space<vmem>>, vector<1x2x128xf32>
      tpu.vector_store %arg14[%c0_67, %c0_68, %c0_69], %183 {strides = array<i32>} : memref<1x2x128xf32, #tpu.memory_space<vmem>>, vector<1x2x128xf32>,
    } else {
    }
    %c0_10 = arith.constant 0 : index
    %c0_11 = arith.constant 0 : index
    %12 = vector.load %arg5[%c0_10, %c0_11] : memref<128x128xf32, #tpu.memory_space<vmem>>, vector<128x128xf32>
    %c0_12 = arith.constant 0 : index
    %c0_13 = arith.constant 0 : index
    %13 = vector.load %arg8[%c0_12, %c0_13] : memref<128x128xf32, #tpu.memory_space<vmem>>, vector<128x128xf32>
    %cst_14 = arith.constant 0.000000e+00 : f32
    %14 = vector.broadcast %cst_14 : f32 to vector<128x128xf32>
    %15 = arith.maximumf %13, %14 : vector<128x128xf32>
    %16 = vector.broadcast %cst_14 : f32 to vector<128x128xf32>
    %17 = arith.subf %13, %16 : vector<128x128xf32>
    %18 = arith.cmpf one, %17, %17 : vector<128x128xf32>
    %19 = vector.broadcast %cst_14 : f32 to vector<128x128xf32>
    %20 = arith.addf %13, %19 : vector<128x128xf32>
    %21 = math.absf %17 : vector<128x128xf32>
    %cst_15 = arith.constant 0.000000e+00 : f32
    %22 = vector.broadcast %cst_15 : f32 to vector<128x128xf32>
    %23 = arith.subf %22, %21 : vector<128x128xf32>
    %24 = math.exp %23 : vector<128x128xf32>
    %25 = math.log1p %24 : vector<128x128xf32>
    %26 = arith.addf %15, %25 : vector<128x128xf32>
    %27 = arith.select %18, %20, %26 : vector<128x128xi1>, vector<128x128xf32>
    %c0_16 = arith.constant 0 : index
    %c0_17 = arith.constant 0 : index
    %28 = vector.load %arg10[%c0_16, %c0_17] : memref<128x128xf32, #tpu.memory_space<vmem>>, vector<128x128xf32>
    %cst_18 = arith.constant 0.000000e+00 : f32
    %29 = vector.broadcast %cst_18 : f32 to vector<128x128xf32>
    %30 = arith.maximumf %28, %29 : vector<128x128xf32>
    %31 = vector.broadcast %cst_18 : f32 to vector<128x128xf32>
    %32 = arith.subf %28, %31 : vector<128x128xf32>
    %33 = arith.cmpf one, %32, %32 : vector<128x128xf32>
    %34 = vector.broadcast %cst_18 : f32 to vector<128x128xf32>
    %35 = arith.addf %28, %34 : vector<128x128xf32>
    %36 = math.absf %32 : vector<128x128xf32>
    %cst_19 = arith.constant 0.000000e+00 : f32
    %37 = vector.broadcast %cst_19 : f32 to vector<128x128xf32>
    %38 = arith.subf %37, %36 : vector<128x128xf32>
    %39 = math.exp %38 : vector<128x128xf32>
    %40 = math.log1p %39 : vector<128x128xf32>
    %41 = arith.addf %30, %40 : vector<128x128xf32>
    %42 = arith.select %33, %35, %41 : vector<128x128xi1>, vector<128x128xf32>
    %c0_20 = arith.constant 0 : index
    %43 = memref.load %arg2[%c0_20] : memref<2xf32, #tpu.memory_space<smem>>
    %c0_21 = arith.constant 0 : index
    %c0_22 = arith.constant 0 : index
    %44 = vector.load %arg7[%c0_21, %c0_22] : memref<128x128xf32, #tpu.memory_space<vmem>>, vector<128x128xf32>
    %45 = tpu.reciprocal %27 {approx = true} : vector<128x128xf32> -> vector<128x128xf32>
    %46 = arith.subf %12, %44 : vector<128x128xf32>
    %47 = arith.mulf %46, %45 : vector<128x128xf32>
    %48 = math.log %27 : vector<128x128xf32>
    %cst_23 = arith.constant -0.918938517 : f32
    %49 = vector.broadcast %cst_23 : f32 to vector<128x128xf32>
    %50 = arith.subf %49, %48 : vector<128x128xf32>
    %cst_24 = arith.constant 5.000000e-01 : f32
    %51 = vector.broadcast %cst_24 : f32 to vector<128x128xf32>
    %52 = arith.mulf %51, %47 : vector<128x128xf32>
    %53 = arith.mulf %52, %47 : vector<128x128xf32>
    %54 = arith.subf %50, %53 : vector<128x128xf32>
    %55 = vector.broadcast %43 : f32 to vector<128x128xf32>
    %56 = arith.addf %55, %54 : vector<128x128xf32>
    %c1 = arith.constant 1 : index
    %57 = memref.load %arg2[%c1] : memref<2xf32, #tpu.memory_space<smem>>
    %c0_25 = arith.constant 0 : index
    %c0_26 = arith.constant 0 : index
    %58 = vector.load %arg9[%c0_25, %c0_26] : memref<128x128xf32, #tpu.memory_space<vmem>>, vector<128x128xf32>
    %59 = tpu.reciprocal %42 {approx = true} : vector<128x128xf32> -> vector<128x128xf32>
    %60 = arith.subf %12, %58 : vector<128x128xf32>
    %61 = arith.mulf %60, %59 : vector<128x128xf32>
    %62 = math.log %42 : vector<128x128xf32>
    %cst_27 = arith.constant -0.918938517 : f32
    %63 = vector.broadcast %cst_27 : f32 to vector<128x128xf32>
    %64 = arith.subf %63, %62 : vector<128x128xf32>
    %cst_28 = arith.constant 5.000000e-01 : f32
    %65 = vector.broadcast %cst_28 : f32 to vector<128x128xf32>
    %66 = arith.mulf %65, %61 : vector<128x128xf32>
    %67 = arith.mulf %66, %61 : vector<128x128xf32>
    %68 = arith.subf %64, %67 : vector<128x128xf32>
    %69 = vector.broadcast %57 : f32 to vector<128x128xf32>
    %70 = arith.addf %69, %68 : vector<128x128xf32>
    %71 = arith.maximumf %56, %70 : vector<128x128xf32>
    %72 = arith.subf %56, %70 : vector<128x128xf32>
    %73 = arith.cmpf one, %72, %72 : vector<128x128xf32>
    %74 = arith.addf %56, %70 : vector<128x128xf32>
    %75 = math.absf %72 : vector<128x128xf32>
    %cst_29 = arith.constant 0.000000e+00 : f32
    %76 = vector.broadcast %cst_29 : f32 to vector<128x128xf32>
    %77 = arith.subf %76, %75 : vector<128x128xf32>
    %78 = math.exp %77 : vector<128x128xf32>
    %79 = math.log1p %78 : vector<128x128xf32>
    %80 = arith.addf %71, %79 : vector<128x128xf32>
    %81 = arith.select %73, %74, %80 : vector<128x128xi1>, vector<128x128xf32>
    %82 = arith.mulf %12, %12 : vector<128x128xf32>
    %cst_30 = arith.constant -27.2990742 : f32
    %83 = vector.broadcast %cst_30 : f32 to vector<128x128xf32>
    %84 = arith.mulf %83, %82 : vector<128x128xf32>
    %cst_31 = arith.constant 0.793379366 : f32
    %85 = vector.broadcast %cst_31 : f32 to vector<128x128xf32>
    %86 = arith.addf %85, %84 : vector<128x128xf32>
    %cst_32 = arith.constant -81377.3984 : f32
    %87 = vector.broadcast %cst_32 : f32 to vector<128x128xf32>
    %88 = arith.mulf %87, %82 : vector<128x128xf32>
    %cst_33 = arith.constant 3.694767 : f32
    %89 = vector.broadcast %cst_33 : f32 to vector<128x128xf32>
    %90 = arith.addf %89, %88 : vector<128x128xf32>
    %91 = arith.maximumf %86, %90 : vector<128x128xf32>
    %92 = arith.subf %86, %90 : vector<128x128xf32>
    %93 = arith.cmpf one, %92, %92 : vector<128x128xf32>
    %94 = arith.addf %86, %90 : vector<128x128xf32>
    %95 = math.absf %92 : vector<128x128xf32>
    %cst_34 = arith.constant 0.000000e+00 : f32
    %96 = vector.broadcast %cst_34 : f32 to vector<128x128xf32>
    %97 = arith.subf %96, %95 : vector<128x128xf32>
    %98 = math.exp %97 : vector<128x128xf32>
    %99 = math.log1p %98 : vector<128x128xf32>
    %100 = arith.addf %91, %99 : vector<128x128xf32>
    %101 = arith.select %93, %94, %100 : vector<128x128xi1>, vector<128x128xf32>
    %c0_i32_35 = arith.constant 0 : i32
    %102 = arith.cmpi eq, %arg0, %c0_i32_35 : i32
    %c0_i32_36 = arith.constant 0 : i32
    %103 = arith.cmpi eq, %arg1, %c0_i32_36 : i32
    %104 = arith.ori %102, %103 : i1
    %105 = arith.extui %104 : i1 to i32
    %c0_i32_37 = arith.constant 0 : i32
    %106 = arith.cmpi ne, %105, %c0_i32_37 : i32
    scf.if %106 {
      %c0_i32_39 = arith.constant 0 : i32
      %110 = arith.cmpi eq, %arg0, %c0_i32_39 : i32
      %c16_i32 = arith.constant 16 : i32
      %c128_i32 = arith.constant 128 : i32
      %111 = arith.select %110, %c16_i32, %c128_i32 : i32
      %112 = tpu.iota {dimensions = array<i32: 0>} : vector<128x128xi32>
      %113 = vector.broadcast %111 : i32 to vector<128x128xi32>
      %114 = arith.cmpi slt, %112, %113 : vector<128x128xi32>
      %c0_i32_40 = arith.constant 0 : i32
      %115 = arith.cmpi eq, %arg1, %c0_i32_40 : i32
      %c32_i32 = arith.constant 32 : i32
      %c128_i32_41 = arith.constant 128 : i32
      %116 = arith.select %115, %c32_i32, %c128_i32_41 : i32
      %117 = tpu.iota {dimensions = array<i32: 1>} : vector<128x128xi32>
      %118 = vector.broadcast %116 : i32 to vector<128x128xi32>
      %119 = arith.cmpi slt, %117, %118 : vector<128x128xi32>
      %120 = arith.andi %114, %119 : vector<128x128xi1>
      %cst_42 = arith.constant 0.000000e+00 : f32
      %121 = vector.broadcast %cst_42 : f32 to vector<128x128xf32>
      %122 = arith.select %120, %101, %121 : vector<128x128xi1>, vector<128x128xf32>
      %123 = vector.shape_cast %122 : vector<128x128xf32> to vector<1x128x128xf32>
      %cst_43 = arith.constant dense<0.000000e+00> : vector<1xf32>
      %124 = vector.multi_reduction <add>, %123, %cst_43 [1, 2] : vector<1x128x128xf32> to vector<1xf32>
      %125 = vector.shape_cast %124 : vector<1xf32> to vector<1x1x1xf32>
      %126 = vector.extract %125[0, 0, 0] : f32 from vector<1x1x1xf32>
      %cst_44 = arith.constant 0.000000e+00 : f32
      %127 = vector.broadcast %cst_44 : f32 to vector<128x128xf32>
      %128 = arith.select %120, %81, %127 : vector<128x128xi1>, vector<128x128xf32>
      %129 = vector.shape_cast %128 : vector<128x128xf32> to vector<1x128x128xf32>
      %cst_45 = arith.constant dense<0.000000e+00> : vector<1xf32>
      %130 = vector.multi_reduction <add>, %129, %cst_45 [1, 2] : vector<1x128x128xf32> to vector<1xf32>
      %131 = vector.shape_cast %130 : vector<1xf32> to vector<1x1x1xf32>
      %132 = vector.extract %131[0, 0, 0] : f32 from vector<1x1x1xf32>
      %133 = tpu.iota {dimensions = array<i32: 1>} : vector<1x2x128xi32>
      %c0_46 = arith.constant 0 : index
      %c0_47 = arith.constant 0 : index
      %c0_48 = arith.constant 0 : index
      %134 = vector.load %arg14[%c0_46, %c0_47, %c0_48] : memref<1x2x128xf32, #tpu.memory_space<vmem>>, vector<1x2x128xf32>
      %c0_i32_49 = arith.constant 0 : i32
      %135 = vector.broadcast %c0_i32_49 : i32 to vector<1x2x128xi32>
      %136 = arith.cmpi eq, %133, %135 : vector<1x2x128xi32>
      %137 = vector.broadcast %126 : f32 to vector<1x2x128xf32>
      %138 = vector.broadcast %132 : f32 to vector<1x2x128xf32>
      %139 = arith.select %136, %137, %138 : vector<1x2x128xi1>, vector<1x2x128xf32>
      %140 = arith.addf %134, %139 : vector<1x2x128xf32>
      %c0_50 = arith.constant 0 : index
      %c0_51 = arith.constant 0 : index
      %c0_52 = arith.constant 0 : index
      %141 = vector.load %arg14[%c0_50, %c0_51, %c0_52] : memref<1x2x128xf32, #tpu.memory_space<vmem>>, vector<1x2x128xf32>
      tpu.vector_store %arg14[%c0_50, %c0_51, %c0_52], %140 {strides = array<i32>} : memref<1x2x128xf32, #tpu.memory_space<vmem>>, vector<1x2x128xf32>,
    } else {
    }
    %true = arith.constant true
    %107 = arith.xori %104, %true : i1
    %108 = arith.extui %107 : i1 to i32
    %c0_i32_38 = arith.constant 0 : i32
    %109 = arith.cmpi ne, %108, %c0_i32_38 : i32
    scf.if %109 {
      %110 = vector.shape_cast %101 : vector<128x128xf32> to vector<1x128x128xf32>
      %cst_39 = arith.constant dense<0.000000e+00> : vector<1xf32>
      %111 = vector.multi_reduction <add>, %110, %cst_39 [1, 2] : vector<1x128x128xf32> to vector<1xf32>
      %112 = vector.shape_cast %111 : vector<1xf32> to vector<1x1x1xf32>
      %113 = vector.extract %112[0, 0, 0] : f32 from vector<1x1x1xf32>
      %114 = vector.shape_cast %81 : vector<128x128xf32> to vector<1x128x128xf32>
      %cst_40 = arith.constant dense<0.000000e+00> : vector<1xf32>
      %115 = vector.multi_reduction <add>, %114, %cst_40 [1, 2] : vector<1x128x128xf32> to vector<1xf32>
      %116 = vector.shape_cast %115 : vector<1xf32> to vector<1x1x1xf32>
      %117 = vector.extract %116[0, 0, 0] : f32 from vector<1x1x1xf32>
      %118 = tpu.iota {dimensions = array<i32: 1>} : vector<1x2x128xi32>
      %c0_41 = arith.constant 0 : index
      %c0_42 = arith.constant 0 : index
      %c0_43 = arith.constant 0 : index
      %119 = vector.load %arg14[%c0_41, %c0_42, %c0_43] : memref<1x2x128xf32, #tpu.memory_space<vmem>>, vector<1x2x128xf32>
      %c0_i32_44 = arith.constant 0 : i32
      %120 = vector.broadcast %c0_i32_44 : i32 to vector<1x2x128xi32>
      %121 = arith.cmpi eq, %118, %120 : vector<1x2x128xi32>
      %122 = vector.broadcast %113 : f32 to vector<1x2x128xf32>
      %123 = vector.broadcast %117 : f32 to vector<1x2x128xf32>
      %124 = arith.select %121, %122, %123 : vector<1x2x128xi1>, vector<1x2x128xf32>
      %125 = arith.addf %119, %124 : vector<1x2x128xf32>
      %c0_45 = arith.constant 0 : index
      %c0_46 = arith.constant 0 : index
      %c0_47 = arith.constant 0 : index
      %126 = vector.load %arg14[%c0_45, %c0_46, %c0_47] : memref<1x2x128xf32, #tpu.memory_space<vmem>>, vector<1x2x128xf32>
      tpu.vector_store %arg14[%c0_45, %c0_46, %c0_47], %125 {strides = array<i32>} : memref<1x2x128xf32, #tpu.memory_space<vmem>>, vector<1x2x128xf32>,
    } else {
    }
    return
  }
  func.func @transform_0(%arg0: i32, %arg1: i32, %arg2: memref<2xf32, #tpu.memory_space<smem>>) -> (i32, i32) {
    %c0_i32 = arith.constant 0 : i32
    %c0_i32_0 = arith.constant 0 : i32
    return %c0_i32, %arg1 : i32, i32
  }
  func.func @transform_1(%arg0: i32, %arg1: i32, %arg2: memref<2xf32, #tpu.memory_space<smem>>) -> (i32, i32) {
    %c0_i32 = arith.constant 0 : i32
    return %arg1, %arg0 : i32, i32
  }
  func.func @transform_2(%arg0: i32, %arg1: i32, %arg2: memref<2xf32, #tpu.memory_space<smem>>) -> (i32, i32) {
    %c0_i32 = arith.constant 0 : i32
    return %arg0, %arg1 : i32, i32
  }
  func.func @transform_3(%arg0: i32, %arg1: i32, %arg2: memref<2xf32, #tpu.memory_space<smem>>) -> (i32, i32) {
    %c0_i32 = arith.constant 0 : i32
    %c0_i32_0 = arith.constant 0 : i32
    return %c0_i32, %arg0 : i32, i32
  }
  func.func @transform_4(%arg0: i32, %arg1: i32, %arg2: memref<2xf32, #tpu.memory_space<smem>>) -> (i32, i32) {
    %c0_i32 = arith.constant 0 : i32
    return %arg0, %arg1 : i32, i32
  }
  func.func @transform_5(%arg0: i32, %arg1: i32, %arg2: memref<2xf32, #tpu.memory_space<smem>>) -> (i32, i32) {
    %c0_i32 = arith.constant 0 : i32
    return %arg0, %arg1 : i32, i32
  }
  func.func @transform_6(%arg0: i32, %arg1: i32, %arg2: memref<2xf32, #tpu.memory_space<smem>>) -> (i32, i32) {
    %c0_i32 = arith.constant 0 : i32
    return %arg0, %arg1 : i32, i32
  }
  func.func @transform_7(%arg0: i32, %arg1: i32, %arg2: memref<2xf32, #tpu.memory_space<smem>>) -> (i32, i32) {
    %c0_i32 = arith.constant 0 : i32
    return %arg0, %arg1 : i32, i32
  }
  func.func @transform_8(%arg0: i32, %arg1: i32, %arg2: memref<2xf32, #tpu.memory_space<smem>>) -> (i32, i32) {
    %c0_i32 = arith.constant 0 : i32
    %c0_i32_0 = arith.constant 0 : i32
    return %c0_i32, %arg0 : i32, i32
  }
  func.func @transform_9(%arg0: i32, %arg1: i32, %arg2: memref<2xf32, #tpu.memory_space<smem>>) -> (i32, i32) {
    %c0_i32 = arith.constant 0 : i32
    %c0_i32_0 = arith.constant 0 : i32
    return %c0_i32, %arg0 : i32, i32
  }
  func.func @transform_10(%arg0: i32, %arg1: i32, %arg2: memref<2xf32, #tpu.memory_space<smem>>) -> (i32, i32) {
    %c0_i32 = arith.constant 0 : i32
    %c0_i32_0 = arith.constant 0 : i32
    return %c0_i32, %arg0 : i32, i32
  }
  func.func @transform_11(%arg0: i32, %arg1: i32, %arg2: memref<2xf32, #tpu.memory_space<smem>>) -> (i32, i32, i32) {
    %c0_i32 = arith.constant 0 : i32
    %c0_i32_0 = arith.constant 0 : i32
    %c0_i32_1 = arith.constant 0 : i32
    return %arg0, %c0_i32, %c0_i32_0 : i32, i32, i32
  }
}

</mosaic_0001>

<bundles_post_ra>
// kernel: tpu_custom_call.1
= control target key start
LH: loop header
LB: loop body
LE: loop exit
PB: predicated region body
PF: predicated region fallthrough
CT: control target
= control target key end

     0   :  { %s3120_s0 = inlined_call_operand.hbm [shape: f32[2], index: 0, kind: input, shape index: {}]   ;;  %s3121_s1 = inlined_call_operand.hbm [shape: f32[8,128], index: 1, kind: input, shape index: {}]   ;;  %s3122_s2 = inlined_call_operand.hbm [shape: f32[128,128], index: 2, kind: input, shape index: {}]   ;;  %s3123_s3 = inlined_call_operand.hbm [shape: f32[128,128], index: 3, kind: input, shape index: {}]   ;;  %s3124_s4 = inlined_call_operand.vmem [shape: f32[1,128], index: 4, kind: input, shape index: {}]   ;;  %s3125_s5 = inlined_call_operand.hbm [shape: f32[128,128], index: 5, kind: input, shape index: {}]   ;;  %s3126_s6 = inlined_call_operand.hbm [shape: f32[128,128], index: 6, kind: input, shape index: {}]   ;;  %s3127_s7 = inlined_call_operand.hbm [shape: f32[128,128], index: 7, kind: input, shape index: {}]   ;;  %s3128_s8 = inlined_call_operand.hbm [shape: f32[128,128], index: 8, kind: input, shape index: {}]   ;;  %s3129_s9 = inlined_call_operand.vmem [shape: f32[1,128], index: 9, kind: input, shape index: {}]   ;;  %s3130_s10 = inlined_call_operand.vmem [shape: f32[1,128], index: 10, kind: input, shape index: {}]   ;;  %s3131_s11 = inlined_call_operand.hbm [shape: f32[8,128], index: 11, kind: output, shape index: {0}]   ;;  %s3132_s12 = inlined_call_operand.hbm [shape: f32[1,2,128], index: 12, kind: output, shape index: {1}]  }
   0x1   :  { %s2404_s23 = scalar_lea.hbm %s3120_s0, 16 }
   0x2   :  { %p2405_p0 = scmp.ne.s32.totalorder %s3120_s0, %s2404_s23  ;;  %p2408_p1 = scmp.lt.u32.totalorder %s2404_s23, %s3120_s0 }
   0x4   :  { %p2410_p2 = pnand %p2408_p1, %p2405_p0 }
   0x6   :  { %2413 = shalt.err (!%p2410_p2)  }
   0x7   :  { %s2626_s28 = smov [#allocation3]  }
   0x8   :  { %19 = dma.hbm_to_smem %s3120_s0, 16, %s2626_s28, [#allocation2] }
   0x9   :  { %2612 = dma.done.wait [#allocation2], 16 }
   0xa   :  { %2613 = vsyncadd [#allocation2], 4294967280 }
   0xb   :  { %21 = sfence }
   0xc   :  { %22 = vsyncpa [#allocation5], 0 }
   0xd   :  { %23 = vsyncpa [#allocation8], 0 }
   0xe   :  { %24 = vsyncpa [#allocation11], 0 }
   0xf   :  { %25 = vsyncpa [#allocation14], 0 }
  0x10   :  { %26 = vsyncpa [#allocation6], 0 }
  0x11   :  { %27 = vsyncpa [#allocation18], 0  ;;  %s2627_s13 = smov [#allocation7]   ;;  %s2414_s17 = scalar_lea.hbm %s3122_s2, 2048 }
  0x12   :  { %s43_s14 = sshll.u32 %s2627_s13, 4  ;;  %p2415_p3 = scmp.ne.s32.totalorder %s3122_s2, %s2414_s17  ;;  %s44_s14 = int_to_ptr.vmem [resolvable:$true] %s43_s14 }
  0x13   :  { %p2418_p4 = scmp.lt.u32.totalorder %s2414_s17, %s3122_s2 }
  0x15   :  { %p2420_p5 = pnand %p2418_p4, %p2415_p3 }
  0x17   :  { %2423 = shalt.err (!%p2420_p5)
}
  0x18   :  { %s2424_s21 = scalar_lea.vmem %s44_s14, 2048  ;;  %p2429_p7 = scmp.lt.s32.totalorder %s44_s14, %s44_s14 }
  0x19   :  { %p2425_p6 = scmp.ne.s32.totalorder %s44_s14, %s2424_s21  ;;  %p2430_p8 = scmp.lt.s32.totalorder %s2424_s21, %s2424_s21 }
  0x1b   :  { %p2431_p9 = por %p2430_p8, %p2429_p7 }
  0x1d   :  { %p2432_p10 = pnand %p2431_p9, %p2425_p6 }
  0x1f   :  { %2435 = shalt.err (!%p2432_p10)
}
  0x20   :  { %s2628_s22 = smov 128   ;;  %s2629_s23 = smov 8  }
  0x21   :  { %49 = dma.hbm_to_vmem [thread:$0]  %s3122_s2, 2048, %s44_s14, [#allocation8], %s2628_s22, %s2628_s22, %s2629_s23  }
  0x22   :  { %s2630_s26 = smov [#allocation10]   ;;  %s2631_s28 = smov [#allocation13]  }
  0x23   :  { %s69_s27 = sshll.u32 %s2630_s26, 4  ;;  %s93_s29 = sshll.u32 %s2631_s28, 4  ;;  %s70_s27 = int_to_ptr.vmem [resolvable:$true] %s69_s27  ;;  %s94_s29 = int_to_ptr.vmem [resolvable:$true] %s93_s29 }
  0x24   :  { %s2436_s15 = scalar_lea.hbm %s3125_s5, 2048 }
  0x25   :  { %p2437_p11 = scmp.ne.s32.totalorder %s3125_s5, %s2436_s15  ;;  %p2440_p12 = scmp.lt.u32.totalorder %s2436_s15, %s3125_s5 }
  0x27   :  { %p2442_p13 = pnand %p2440_p12, %p2437_p11 }
  0x29   :  { %2445 = shalt.err (!%p2442_p13)
}
  0x2a   :  { %s2446_s2 = scalar_lea.vmem %s70_s27, 2048  ;;  %p2451_p1 = scmp.lt.s32.totalorder %s70_s27, %s70_s27 }
  0x2b   :  { %p2447_p0 = scmp.ne.s32.totalorder %s70_s27, %s2446_s2  ;;  %p2452_p2 = scmp.lt.s32.totalorder %s2446_s2, %s2446_s2 }
  0x2d   :  { %p2453_p3 = por %p2452_p2, %p2451_p1 }
  0x2f   :  { %p2454_p4 = pnand %p2453_p3, %p2447_p0 }
  0x31   :  { %2457 = shalt.err (!%p2454_p4)
}
  0x32   :  { %75 = dma.hbm_to_vmem [thread:$0]  %s3125_s5, 2048, %s70_s27, [#allocation11], %s2628_s22, %s2628_s22, %s2629_s23  }
  0x33   :  { %s2458_s24 = scalar_lea.hbm %s3127_s7, 2048 }
  0x34   :  { %p2459_p5 = scmp.ne.s32.totalorder %s3127_s7, %s2458_s24  ;;  %p2462_p6 = scmp.lt.u32.totalorder %s2458_s24, %s3127_s7 }
  0x36   :  { %p2464_p7 = pnand %p2462_p6, %p2459_p5 }
  0x38   :  { %2467 = shalt.err (!%p2464_p7)
}
  0x39   :  { %s2468_s13 = scalar_lea.vmem %s94_s29, 2048  ;;  %p2473_p9 = scmp.lt.s32.totalorder %s94_s29, %s94_s29 }
  0x3a   :  { %p2469_p8 = scmp.ne.s32.totalorder %s94_s29, %s2468_s13  ;;  %p2474_p10 = scmp.lt.s32.totalorder %s2468_s13, %s2468_s13 }
  0x3c   :  { %p2475_p11 = por %p2474_p10, %p2473_p9 }
  0x3e   :  { %p2476_p12 = pnand %p2475_p11, %p2469_p8 }
  0x40   :  { %2479 = shalt.err (!%p2476_p12)
}
  0x41   :  { %99 = dma.hbm_to_vmem [thread:$0]  %s3127_s7, 2048, %s94_s29, [#allocation14], %s2628_s22, %s2628_s22, %s2629_s23  }
  0x42   :  { %s2632_s15 = smov [#allocation4]   ;;  %s2633_s17 = smov [#allocation9]  }
  0x43   :  { %s34_s16 = sshll.u32 %s2632_s15, 4  ;;  %s55_s18 = sshll.u32 %s2633_s17, 4  ;;  %s35_s16 = int_to_ptr.vmem [resolvable:$true] %s34_s16  ;;  %s56_s18 = int_to_ptr.vmem [resolvable:$true] %s55_s18 }
  0x44   :  { %s2480_s14 = scalar_lea.hbm %s3121_s1, 128 }
  0x45   :  { %p2481_p13 = scmp.ne.s32.totalorder %s3121_s1, %s2480_s14  ;;  %p2484_p0 = scmp.lt.u32.totalorder %s2480_s14, %s3121_s1 }
  0x47   :  { %p2486_p1 = pnand %p2484_p0, %p2481_p13 }
  0x49   :  { %2489 = shalt.err (!%p2486_p1)
}
  0x4a   :  { %s2490_s7 = scalar_lea.vmem %s35_s16, 128  ;;  %p2495_p3 = scmp.lt.s32.totalorder %s35_s16, %s35_s16 }
  0x4b   :  { %p2491_p2 = scmp.ne.s32.totalorder %s35_s16, %s2490_s7  ;;  %p2496_p4 = scmp.lt.s32.totalorder %s2490_s7, %s2490_s7 }
  0x4d   :  { %p2497_p5 = por %p2496_p4, %p2495_p3 }
  0x4f   :  { %p2498_p6 = pnand %p2497_p5, %p2491_p2 }
  0x51   :  { %2501 = shalt.err (!%p2498_p6)
}
  0x52   :  { %37 = dma.hbm_to_vmem [thread:$0]  %s3121_s1, 128, %s35_s16, [#allocation5]  }
  0x53   :  { %s2502_s30 = scalar_lea.hbm %s3123_s3, 2048 }
  0x54   :  { %p2503_p7 = scmp.ne.s32.totalorder %s3123_s3, %s2502_s30  ;;  %p2506_p8 = scmp.lt.u32.totalorder %s2502_s30, %s3123_s3 }
  0x56   :  { %p2508_p9 = pnand %p2506_p8, %p2503_p7 }
  0x58   :  { %2511 = shalt.err (!%p2508_p9)
}
  0x59   :  { %s2512_s17 = scalar_lea.vmem %s56_s18, 2048  ;;  %p2517_p11 = scmp.lt.s32.totalorder %s56_s18, %s56_s18 }
  0x5a   :  { %p2513_p10 = scmp.ne.s32.totalorder %s56_s18, %s2512_s17  ;;  %p2518_p12 = scmp.lt.s32.totalorder %s2512_s17, %s2512_s17 }
  0x5c   :  { %p2519_p13 = por %p2518_p12, %p2517_p11 }
  0x5e   :  { %p2520_p0 = pnand %p2519_p13, %p2513_p10 }
  0x60   :  { %2523 = shalt.err (!%p2520_p0)
}
  0x61   :  { %61 = dma.hbm_to_vmem [thread:$0]  %s3123_s3, 2048, %s56_s18, [#allocation8], %s2628_s22, %s2628_s22, %s2629_s23  }
  0x62   :  { %s2634_s19 = smov [#allocation12]   ;;  %s2635_s14 = smov [#allocation15]  }
  0x63   :  { %s81_s2 = sshll.u32 %s2634_s19, 4  ;;  %s105_s0 = sshll.u32 %s2635_s14, 4  ;;  %s82_s2 = int_to_ptr.vmem [resolvable:$true] %s81_s2  ;;  %s106_s0 = int_to_ptr.vmem [resolvable:$true] %s105_s0 }
  0x64   :  { %s2524_s24 = scalar_lea.hbm %s3126_s6, 2048 }
  0x65   :  { %p2525_p1 = scmp.ne.s32.totalorder %s3126_s6, %s2524_s24  ;;  %p2528_p2 = scmp.lt.u32.totalorder %s2524_s24, %s3126_s6 }
  0x67   :  { %p2530_p3 = pnand %p2528_p2, %p2525_p1 }
  0x69   :  { %2533 = shalt.err (!%p2530_p3)
}
  0x6a   :  { %s2534_s3 = scalar_lea.vmem %s82_s2, 2048  ;;  %p2539_p5 = scmp.lt.s32.totalorder %s82_s2, %s82_s2 }
  0x6b   :  { %p2535_p4 = scmp.ne.s32.totalorder %s82_s2, %s2534_s3  ;;  %p2540_p6 = scmp.lt.s32.totalorder %s2534_s3, %s2534_s3 }
  0x6d   :  { %p2541_p7 = por %p2540_p6, %p2539_p5 }
  0x6f   :  { %p2542_p8 = pnand %p2541_p7, %p2535_p4 }
  0x71   :  { %2545 = shalt.err (!%p2542_p8)
}
  0x72   :  { %87 = dma.hbm_to_vmem [thread:$0]  %s3126_s6, 2048, %s82_s2, [#allocation11], %s2628_s22, %s2628_s22, %s2629_s23  }
  0x73   :  { %s2546_s5 = scalar_lea.hbm %s3128_s8, 2048 }
  0x74   :  { %p2547_p9 = scmp.ne.s32.totalorder %s3128_s8, %s2546_s5  ;;  %p2550_p10 = scmp.lt.u32.totalorder %s2546_s5, %s3128_s8 }
  0x76   :  { %p2552_p11 = pnand %p2550_p10, %p2547_p9 }
  0x78   :  { %2555 = shalt.err (!%p2552_p11)
}
  0x79   :  { %s2556_s16 = scalar_lea.vmem %s106_s0, 2048  ;;  %p2561_p13 = scmp.lt.s32.totalorder %s106_s0, %s106_s0 }
  0x7a   :  { %p2557_p12 = scmp.ne.s32.totalorder %s106_s0, %s2556_s16  ;;  %p2562_p0 = scmp.lt.s32.totalorder %s2556_s16, %s2556_s16 }
  0x7c   :  { %p2563_p1 = por %p2562_p0, %p2561_p13 }
  0x7e   :  { %p2564_p2 = pnand %p2563_p1, %p2557_p12 }
  0x80   :  { %2567 = shalt.err (!%p2564_p2)
}
  0x81   :  { %111 = dma.hbm_to_vmem [thread:$0]  %s3128_s8, 2048, %s106_s0, [#allocation14], %s2628_s22, %s2628_s22, %s2629_s23  }
  0x82   :  { %2614 = dma.done.wait [#allocation5], 128  }
  0x83   :  { %2615 = vsyncadd [#allocation5], 4294967168 }
  0x84   :  { %2616 = dma.done.wait [#allocation8], 4096  }
  0x85   :  { %2617 = vsyncadd [#allocation8], 4294963200 }
  0x86   :  { %2618 = dma.done.wait [#allocation11], 4096  }
  0x87   :  { %2619 = vsyncadd [#allocation11], 4294963200 }
  0x88   :  { %2620 = dma.done.wait [#allocation14], 4096  }
  0x89   :  { %2621 = vsyncadd [#allocation14], 4294963200  ;;  %v2636_v0 = vmov 0.0|0.0   ;;  %vm2637_vm0 = vmmov 0   ;;  %v2638_v1 = vmov 0.0   ;;  %v151_v2 = vld [vmem:[#allocation7] sm:$0xff] }
  0x8a   :  { %2297 = vmatprep.subr.bf16.mxu0 %v2636_v0  ;;  %2294 = vmatprep.mubr.msk.f32.mxu0 %vm2637_vm0, %v2638_v1  ;;  %242 = vst [vmem:[#allocation17] sm:$0x3] %v2638_v1  ;;  %v152_v3 = vld [vmem:[#allocation7 + $0x8] sm:$0xff]  ;;  %v153_v4 = vld [vmem:[#allocation7 + $0x10] sm:$0xff]  ;;  %v154_v6 = vld [vmem:[#allocation7 + $0x18] sm:$0xff]  ;;  %vm305_vm5 = vcmask 1040384  }
  0x8b   :  { %v2298_v5 = vpack.c.bf16 %v152_v3, %v151_v2  ;;  %v2824_v7 = vld [vmem:[%s3124_s4] sm:$0x1]  ;;  %v2301_v8 = vpack.c.bf16 %v154_v6, %v153_v4  ;;  %v155_v11 = vld [vmem:[#allocation7 + $0x20] sm:$0xff]  ;;  %v156_v12 = vld [vmem:[#allocation7 + $0x28] sm:$0xff]  ;;  %s3082_s0 = sld [smem:[#allocation3 + $0x1]]  ;;  %s2639_s24 = smov [#allocation16]  }
  0x8c   :  { %v263_v9 = vmul.f32 %v2824_v7, %v2824_v7  ;;  %v2831_v10 = vld [vmem:[%s3130_s10] sm:$0x1]  ;;  %v2835_v17 = vld [vmem:[#allocation9] sm:$0xff]  ;;  %v2837_v18 = vld [vmem:[#allocation9 + $0x8] sm:$0xff]  ;;  %v2304_v19 = vpack.c.bf16 %v156_v12, %v155_v11  ;;  %s2217_s7 = sshll.u32 %s2639_s24, 4  ;;  %s2218_s7 = int_to_ptr.vmem [resolvable:$true] %s2217_s7 }
  0x8d   :  { %2299 = vmatpush3.bf16.msra.mxu0 %v2298_v5  ;;  %v248_v13 = vand.u32 2147483647, %v2831_v10  ;;  %v1619_v22 = vmul.f32 %v2835_v17, %v2835_v17  ;;  %v157_v23 = vld [vmem:[#allocation7 + $0x30] sm:$0xff]  ;;  %v158_v24 = vld [vmem:[#allocation7 + $0x38] sm:$0xff]  ;;  %v1620_v26 = vmul.f32 %v2837_v18, %v2837_v18  ;;  %v159_v33 = vld [vmem:[#allocation7 + $0x40] sm:$0xff]  ;;  %vm246_vm1 = vcmp.ne.f32.partialorder %v2831_v10, %v2831_v10  ;;  %s2568_s29 = scalar_lea.vmem %s2218_s7, 128  ;;  %p2573_p4 = scmp.lt.s32.totalorder %s2218_s7, %s2218_s7 }
  0x8e   :  { %2300 = vmatprep.subr.bf16.mxu0 %v2636_v0  ;;  %v264_v14 = vmul.f32 -27.299074, %v263_v9  ;;  %v266_v15 = vmul.f32 -81377.4, %v263_v9  ;;  %v2307_v31 = vpack.c.bf16 %v158_v24, %v157_v23  ;;  %v160_v34 = vld [vmem:[#allocation7 + $0x48] sm:$0xff]  ;;  %v2862_v41 = vld [vmem:[#allocation12] sm:$0xff]  ;;  %p2569_p3 = scmp.ne.s32.totalorder %s2218_s7, %s2568_s29  ;;  %p2574_p5 = scmp.lt.s32.totalorder %s2568_s29, %s2568_s29 }
  0x8f   :  { %v249_v16 = vsub.f32 0.0, %v248_v13  ;;  %v1635_v28 = vmul.f32 -27.299074, %v1619_v22  ;;  %v1636_v29 = vmul.f32 -27.299074, %v1620_v26  ;;  %v2868_v43 = vld [vmem:[#allocation12 + $0x8] sm:$0xff]  ;;  %v2310_v45 = vpack.c.bf16 %v160_v34, %v159_v33 }
  0x90   :  { %v2839_v20 = vadd.f32 0.79337937, %v264_v14  ;;  %v2841_v21 = vadd.f32 3.694767, %v266_v15  ;;  %v1667_v30 = vmul.f32 -81377.4, %v1619_v22  ;;  %v299_v22 = vlaneseq  ;;  %p2575_p6 = por %p2574_p5, %p2573_p4 }
  0x91   :  { %2302 = vmatpush3.bf16.msra.mxu0 %v2301_v8  ;;  %v250_v25 = vmul.f32 1.442695, %v249_v16  ;;  %v1668_v35 = vmul.f32 -81377.4, %v1620_v26  ;;  %v2854_v36 = vadd.f32 0.79337937, %v1635_v28  ;;  %vm383_vm11 = vcmp.ne.f32.partialorder %v2862_v41, %v2862_v41 }
  0x92   :  { %2303 = vmatprep.subr.bf16.mxu0 %v2636_v0  ;;  %v2850_v27 = vsub.f32 %v2839_v20, %v2841_v21  ;;  %v2856_v37 = vadd.f32 0.79337937, %v1636_v29  ;;  %v2858_v38 = vadd.f32 3.694767, %v1667_v30  ;;  %v161_v47 = vld [vmem:[#allocation7 + $0x50] sm:$0xff]  ;;  %v162_v48 = vld [vmem:[#allocation7 + $0x58] sm:$0xff]  ;;  %vm384_vm13 = vcmp.ne.f32.partialorder %v2868_v43, %v2868_v43  ;;  %p2576_p7 = pnand %p2575_p6, %p2569_p3 }
  0x93   :  { %2344 = vpow2.f32 %v250_v25  ;;  %v2860_v40 = vadd.f32 3.694767, %v1668_v35  ;;  %v415_v50 = vand.u32 2147483647, %v2862_v41  ;;  %v416_v52 = vand.u32 2147483647, %v2868_v43 }
  0x94   :  { %v272_v32 = vand.u32 2147483647, %v2850_v27  ;;  %v2866_v42 = vsub.f32 %v2854_v36, %v2858_v38  ;;  %v2879_v53 = vld [vmem:[#allocation15] sm:$0xff]  ;;  %v2313_v56 = vpack.c.bf16 %v162_v48, %v161_v47  ;;  %v2881_v59 = vld [vmem:[#allocation15 + $0x8] sm:$0xff]  ;;  %v165_v12 = vld [vmem:[#allocation7 + $0x70] sm:$0xff]  ;;  %v2894_v30 = vand.u32 127, %v299_v22 }
  0x95   :  { %2305 = vmatpush3.bf16.msra.mxu0 %v2304_v19  ;;  %v2872_v46 = vsub.f32 %v2856_v37, %v2860_v40  ;;  %v431_v55 = vsub.f32 0.0, %v415_v50  ;;  %v432_v58 = vsub.f32 0.0, %v416_v52  ;;  %v163_v61 = vld [vmem:[#allocation7 + $0x60] sm:$0xff]  ;;  %v164_v62 = vld [vmem:[#allocation7 + $0x68] sm:$0xff]  ;;  %v719_v1 = vand.u32 2147483647, %v2879_v53 }
  0x96   :  { %2306 = vmatprep.subr.bf16.mxu0 %v2636_v0  ;;  %v273_v39 = vsub.f32 0.0, %v272_v32  ;;  %v1763_v49 = vand.u32 2147483647, %v2866_v42  ;;  %v720_v6 = vand.u32 2147483647, %v2881_v59  ;;  %v2316_v9 = vpack.c.bf16 %v164_v62, %v163_v61  ;;  %v166_v13 = vld [vmem:[#allocation7 + $0x78] sm:$0xff] }
  0x97   :  { %v1764_v51 = vand.u32 2147483647, %v2872_v46  ;;  %v447_v4 = vmul.f32 1.442695, %v431_v55  ;;  %v449_v5 = vmul.f32 1.442695, %v432_v58  ;;  %v2319_v23 = vpack.c.bf16 %v166_v13, %v165_v12 }
  0x98   :  { %v274_v44 = vmul.f32 1.442695, %v273_v39  ;;  %v1779_v54 = vsub.f32 0.0, %v1763_v49  ;;  %v735_v8 = vsub.f32 0.0, %v719_v1  ;;  %v736_v14 = vsub.f32 0.0, %v720_v6 }
  0x99   :  { %2308 = vmatpush3.bf16.msra.mxu0 %v2307_v31  ;;  %v1780_v57 = vsub.f32 0.0, %v1764_v51  ;;  %v2891_v28 = vld [vmem:[%s3129_s9] sm:$0x1]  ;;  %v245_v33 = vmax.f32 %v2831_v10, 0.0  ;;  %v268_v39 = vmax.f32 %v2839_v20, %v2841_v21  ;;  %v1699_v50 = vmax.f32 %v2854_v36, %v2858_v38  ;;  %s3078_s9 = sld [smem:[#allocation3]] }
  0x9a   :  { %2309 = vmatprep.subr.bf16.mxu0 %v2636_v0  ;;  %2346 = vpow2.f32 %v274_v44  ;;  %v1795_v63 = vmul.f32 1.442695, %v1779_v54  ;;  %v751_v15 = vmul.f32 1.442695, %v735_v8  ;;  %v753_v16 = vmul.f32 1.442695, %v736_v14 }
  0x9b   :  { %v1797_v3 = vmul.f32 1.442695, %v1780_v57  ;;  %v150_v31 = vld [vmem:[#allocation4] sm:$0xff]  ;;  %v289_v34 = vsub.f32 %v2824_v7, %v2891_v28  ;;  %v2907_v44 = vadd.f32 %v2841_v21, %v2839_v20  ;;  %v367_v51 = vmax.f32 %v2862_v41, 0.0 }
  0x9c   :  { %2348 = vpow2.f32 %v1795_v63  ;;  %v368_v52 = vmax.f32 %v2868_v43, 0.0  ;;  %vm270_vm3 = vcmp.ne.f32.partialorder %v2850_v27, %v2850_v27  ;;  %v2926_v21 = vadd.f32 %v2858_v38, %v2854_v36 }
  0x9d   :  { %2311 = vmatpush3.bf16.msra.mxu0 %v2310_v45  ;;  %v2345_v60 = vpop.eup %2344  ;;  %vm302_vm4 = vcmp.lt.s32.totalorder %v2894_v30, 16  ;;  %v1700_v63 = vmax.f32 %v2856_v37, %v2860_v40  ;;  %vm1731_vm7 = vcmp.ne.f32.partialorder %v2866_v42, %v2866_v42  ;;  %vm2047_vm8 = vcmp.lt.s32.totalorder %v2894_v30, 32 }
  0x9e   :  { %2312 = vmatprep.subr.bf16.mxu0 %v2636_v0  ;;  %v252_v2 = vadd.f32 1.0, %v2345_v60  ;;  %v255_v11 = vmul.f32 -0.5, %v2345_v60  ;;  %v258_v26 = vand.u32 2147483647, %v2345_v60  ;;  %vm1732_vm9 = vcmp.ne.f32.partialorder %v2872_v46, %v2872_v46 }
  0xa0   :  { %2350 = vlog2.f32 %v252_v2  ;;  %v256_v25 = vadd.f32 1.0, %v255_v11  ;;  %vm2909_vm2 = vcmp.lt.f32.partialorder %v258_v26, 0.0004427343 }
  0xa1   :  { %2314 = vmatpush3.bf16.msra.mxu0 %v2313_v56  ;;  %2352 = vpow2.f32 %v1797_v3  ;;  %v2943_v3 = vadd.f32 %v2860_v40, %v2856_v37 }
  0xa2   :  { %2315 = vmatprep.subr.bf16.mxu0 %v2636_v0  ;;  %2354 = vpow2.f32 %v447_v4 }
  0xa3   :  { %2356 = vpow2.f32 %v449_v5  ;;  %v671_v5 = vmax.f32 %v2879_v53, 0.0 }
  0xa4   :  { %v2347_v19 = vpop.eup %2346  ;;  %2358 = vpow2.f32 %v751_v15 }
  0xa5   :  { %2317 = vmatpush3.bf16.msra.mxu0 %v2316_v9  ;;  %v276_v24 = vadd.f32 1.0, %v2347_v19  ;;  %2360 = vpow2.f32 %v753_v16  ;;  %v279_v29 = vmul.f32 -0.5, %v2347_v19  ;;  %v282_v57 = vand.u32 2147483647, %v2347_v19 }
  0xa6   :  { %2318 = vmatprep.subr.bf16.mxu0 %v2636_v0  ;;  %v2896_v32 = vpop.eup %2348  ;;  %v257_v0 = vmul.f32 %v2345_v60, %v256_v25  ;;  %v672_v16 = vmax.f32 %v2881_v59, 0.0 }
  0xa7   :  { %2362 = vlog2.f32 %v276_v24  ;;  %v1827_v47 = vadd.f32 1.0, %v2896_v32  ;;  %v280_v20 = vadd.f32 1.0, %v279_v29  ;;  %v1830_v60 = vmul.f32 -0.5, %v2896_v32 }
  0xa8   :  { %v1833_v4 = vand.u32 2147483647, %v2896_v32  ;;  %vm2955_vm6 = vcmp.lt.f32.partialorder %v282_v57, 0.0004427343 }
  0xa9   :  { %2320 = vmatpush3.bf16.msra.mxu0 %v2319_v23  ;;  %2364 = vlog2.f32 %v1827_v47  ;;  %v281_v8 = vmul.f32 %v2347_v19, %v280_v20  ;;  %v1831_v15 = vadd.f32 1.0, %v1830_v60 }
  0xaa   :  { %v2351_v35 = vpop.eup %2350  ;;  %vm2966_vm10 = vcmp.lt.f32.partialorder %v1833_v4, 0.0004427343 }
  0xab   :  { %v2914_v48 = vpop.eup %2352  ;;  %v254_v49 = vmul.f32 0.6931472, %v2351_v35  ;;  %v1832_v45 = vmul.f32 %v2896_v32, %v1831_v15 }
  0xac   :  { %2295 = vmatmul.mubr.f32.vlgmr.msra.gmra.mrb[0].mxu0 %v150_v31  ;;  %v2920_v54 = vpop.eup %2354  ;;  %v1836_v55 = vadd.f32 1.0, %v2914_v48  ;;  %v1839_v1 = vmul.f32 -0.5, %v2914_v48  ;;  %v1842_v25 = vand.u32 2147483647, %v2914_v48 }
  0xad   :  { %v2929_v56 = vpop.eup %2356  ;;  %v260_v58 = vsel %vm2909_vm2, %v257_v0, %v254_v49  ;;  %v479_v61 = vadd.f32 1.0, %v2920_v54  ;;  %v482_v11 = vmul.f32 -0.5, %v2920_v54  ;;  %vm687_vm2 = vcmp.ne.f32.partialorder %v2879_v53, %v2879_v53 }
  0xae   :  { %v261_v62 = vadd.f32 %v260_v58, %v245_v33  ;;  %2366 = vlog2.f32 %v1836_v55  ;;  %v2939_v2 = vpop.eup %2358  ;;  %v488_v12 = vadd.f32 1.0, %v2929_v56  ;;  %v1840_v23 = vadd.f32 1.0, %v1839_v1 }
  0xaf   :  { %2368 = vlog2.f32 %v479_v61  ;;  %v2947_v6 = vpop.eup %2360  ;;  %v783_v26 = vadd.f32 1.0, %v2939_v2  ;;  %v483_v31 = vadd.f32 1.0, %v482_v11  ;;  %v485_v33 = vand.u32 2147483647, %v2920_v54 }
  0xb0   :  { %v262_v9 = vsel %vm246_vm1, %v2831_v10, %v261_v62  ;;  %v491_v10 = vmul.f32 -0.5, %v2929_v56  ;;  %v792_v0 = vadd.f32 1.0, %v2947_v6  ;;  %v786_v47 = vmul.f32 -0.5, %v2939_v2 }
  0xb1   :  { %v2363_v13 = vpop.eup %2362  ;;  %2370 = vrcp.f32 %v262_v9  ;;  %v1841_v20 = vmul.f32 %v2914_v48, %v1840_v23  ;;  %v494_v57 = vand.u32 2147483647, %v2929_v56  ;;  %v795_v32 = vmul.f32 -0.5, %v2947_v6 }
  0xb2   :  { %v278_v19 = vmul.f32 0.6931472, %v2363_v13  ;;  %2372 = vlog2.f32 %v262_v9  ;;  %v492_v55 = vadd.f32 1.0, %v491_v10  ;;  %vm2990_vm12 = vcmp.lt.f32.partialorder %v1842_v25, 0.0004427343 }
  0xb3   :  { %2374 = vlog2.f32 %v488_v12  ;;  %v2365_v49 = vpop.eup %2364  ;;  %v484_v1 = vmul.f32 %v2920_v54, %v483_v31  ;;  %vm2997_vm14 = vcmp.lt.f32.partialorder %v485_v33, 0.0004427343  ;;  %v787_v11 = vadd.f32 1.0, %v786_v47 }
  0xb4   :  { %v284_v29 = vsel %vm2955_vm6, %v281_v8, %v278_v19  ;;  %2376 = vlog2.f32 %v783_v26  ;;  %v1829_v60 = vmul.f32 0.6931472, %v2365_v49  ;;  %vm3007_vm15 = vcmp.lt.f32.partialorder %v494_v57, 0.0004427343 }
  0xb5   :  { %v285_v35 = vadd.f32 %v284_v29, %v268_v39  ;;  %2378 = vlog2.f32 %v792_v0  ;;  %v789_v39 = vand.u32 2147483647, %v2939_v2  ;;  %v798_v14 = vand.u32 2147483647, %v2947_v6 }
  0xb6   :  { %v1835_v8 = vsel %vm2966_vm10, %v1832_v45, %v1829_v60  ;;  %v493_v23 = vmul.f32 %v2929_v56, %v492_v55  ;;  %v796_v24 = vadd.f32 1.0, %v795_v32  ;;  %v788_v28 = vmul.f32 %v2939_v2, %v787_v11 }
  0xb7   :  { %v286_v58 = vsel %vm270_vm3, %v2907_v44, %v285_v35  ;;  %v1971_v12 = vadd.f32 %v1835_v8, %v1699_v50  ;;  %vm3015_vm0 = vcmp.lt.f32.partialorder %v789_v39, 0.0004427343  ;;  %vm3040_vm1 = vcmp.lt.f32.partialorder %v798_v14, 0.0004427343  ;;  %v960_v39 = vld [vmem:[#allocation10] sm:$0xff] }
  0xb8   :  { %v2367_v61 = vpop.eup %2366  ;;  %v303_v62 = vsel %vm302_vm4, %v286_v58, 0.0  ;;  %v797_v2 = vmul.f32 %v2947_v6, %v796_v24  ;;  %vm688_vm3 = vcmp.ne.f32.partialorder %v2881_v59, %v2881_v59 }
  0xb9   :  { %v2369_v44 = vpop.eup %2368  ;;  %v306_v4 = vsel %vm305_vm5, %v303_v62, 0.0  ;;  %v1838_v9 = vmul.f32 0.6931472, %v2367_v61  ;;  %v1987_v25 = vsel %vm1731_vm7, %v2926_v21, %v1971_v12  ;;  %v961_v61 = vld [vmem:[#allocation10 + $0x8] sm:$0xff]  ;;  %v1138_v62 = vld [vmem:[#allocation13] sm:$0xff] }
  0xba   :  { %307 = vadd.xlane.f32.xlu0 %v306_v4  ;;  %v481_v13 = vmul.f32 0.6931472, %v2369_v44  ;;  %v2064_v31 = vsel %vm2047_vm8, %v1987_v25, 0.0  ;;  %v1170_v44 = vsub.f32 %v2835_v17, %v1138_v62 }
  0xbb   :  { %v2371_v15 = vpop.eup %2370  ;;  %v1844_v19 = vsel %vm2990_vm12, %v1841_v20, %v1838_v9 }
  0xbc   :  { %v2373_v36 = vpop.eup %2372  ;;  %v290_v38 = vmul.f32 %v2371_v15, %v289_v34  ;;  %v1972_v50 = vadd.f32 %v1844_v19, %v1700_v63  ;;  %v487_v56 = vsel %vm2997_vm14, %v484_v1, %v481_v13  ;;  %v1139_v1 = vld [vmem:[#allocation13 + $0x8] sm:$0xff]  ;;  %v1298_v34 = vstv %s3082_s0 }
  0xbd   :  { %v2375_v26 = vpop.eup %2374  ;;  %v292_v29 = vmul.f32 0.6931472, %v2373_v36  ;;  %v623_v7 = vadd.f32 %v487_v56, %v367_v51  ;;  %v1171_v8 = vsub.f32 %v2837_v18, %v1139_v1 }
  0xbe   :  { %v294_v37 = vmul.f32 0.5, %v290_v38  ;;  %v1988_v40 = vsel %vm1732_vm9, %v2943_v3, %v1972_v50  ;;  %v490_v42 = vmul.f32 0.6931472, %v2375_v26  ;;  %v2377_v21 = vpop.eup %2376  ;;  %v1120_v26 = vstv %s3078_s9 }
  0xbf   :  { %v293_v63 = vsub.f32 -0.9189385, %v292_v29  ;;  %v2065_v33 = vsel %vm2047_vm8, %v1988_v40, 0.0  ;;  %v639_v51 = vsel %vm383_vm11, %v2862_v41, %v623_v7  ;;  %v2379_v0 = vpop.eup %2378  ;;  %v785_v45 = vmul.f32 0.6931472, %v2377_v21 }
  0xc0   :  { %v295_v46 = vmul.f32 %v294_v37, %v290_v38  ;;  %v2080_v3 = vadd.f32 %v2065_v33, %v2064_v31  ;;  %v496_v35 = vsel %vm3007_vm15, %v493_v23, %v490_v42  ;;  %v794_v49 = vmul.f32 0.6931472, %v2379_v0 }
  0xc1   :  { %v624_v47 = vadd.f32 %v496_v35, %v368_v52  ;;  %2380 = vrcp.f32 %v639_v51  ;;  %v791_v41 = vsel %vm3015_vm0, %v788_v28, %v785_v45 }
  0xc2   :  { %v296_v20 = vsub.f32 %v293_v63, %v295_v46  ;;  %2095 = vadd.xlane.f32.xlu1 %v2080_v3  ;;  %2382 = vlog2.f32 %v639_v51  ;;  %v800_v52 = vsel %vm3040_vm1, %v797_v2, %v794_v49  ;;  %v927_v55 = vadd.f32 %v791_v41, %v671_v5 }
  0xc3   :  { %v640_v6 = vsel %vm384_vm13, %v2868_v43, %v624_v47  ;;  %v928_v58 = vadd.f32 %v800_v52, %v672_v16  ;;  %v992_v5 = vsub.f32 %v2835_v17, %v960_v39  ;;  %v993_v16 = vsub.f32 %v2837_v18, %v961_v61 }
  0xc4   :  { %v304_v57 = vsel %vm302_vm4, %v296_v20, 0.0  ;;  %2384 = vrcp.f32 %v640_v6  ;;  %v943_v43 = vsel %vm687_vm2, %v2879_v53, %v927_v55 }
  0xc5   :  { %v316_v60 = vsel %vm305_vm5, %v304_v57, 0.0  ;;  %2386 = vlog2.f32 %v640_v6  ;;  %v944_v32 = vsel %vm688_vm3, %v2881_v59, %v928_v58 }
  0xc6   :  { %317 = vadd.xlane.f32.xlu0 %v316_v60  ;;  %2388 = vrcp.f32 %v943_v43 }
  0xc7   :  { %2390 = vrcp.f32 %v944_v32 }
  0xc8   :  { %2392 = vlog2.f32 %v943_v43 }
  0xc9   :  { %2394 = vlog2.f32 %v944_v32 }
  0xcb   :  { %v2381_v48 = vpop.eup %2380 }
  0xcc   :  { %v2383_v27 = vpop.eup %2382  ;;  %v1008_v53 = vmul.f32 %v2381_v48, %v992_v5 }
  0xcd   :  { %v1025_v4 = vmul.f32 0.6931472, %v2383_v27 }
  0xce   :  { %v2385_v59 = vpop.eup %2384  ;;  %v1072_v9 = vmul.f32 0.5, %v1008_v53 }
  0xcf   :  { %v2387_v11 = vpop.eup %2386  ;;  %v1009_v12 = vmul.f32 %v2385_v59, %v993_v16  ;;  %v1056_v13 = vsub.f32 -0.9189385, %v1025_v4 }
  0xd0   :  { %v2389_v54 = vpop.eup %2388  ;;  %v1027_v14 = vmul.f32 0.6931472, %v2387_v11  ;;  %v1088_v15 = vmul.f32 %v1072_v9, %v1008_v53 }
  0xd1   :  { %v2391_v19 = vpop.eup %2390  ;;  %v1073_v23 = vmul.f32 0.5, %v1009_v12  ;;  %v1186_v10 = vmul.f32 %v2389_v54, %v1170_v44 }
  0xd2   :  { %v2393_v24 = vpop.eup %2392  ;;  %v1057_v17 = vsub.f32 -0.9189385, %v1027_v14  ;;  %v1187_v36 = vmul.f32 %v2391_v19, %v1171_v8  ;;  %v1104_v18 = vsub.f32 %v1056_v13, %v1088_v15 }
  0xd3   :  { %v2395_v38 = vpop.eup %2394  ;;  %v1089_v50 = vmul.f32 %v1073_v23, %v1009_v12  ;;  %v1203_v25 = vmul.f32 0.6931472, %v2393_v24  ;;  %v1250_v56 = vmul.f32 0.5, %v1186_v10 }
  0xd4   :  { %v1205_v29 = vmul.f32 0.6931472, %v2395_v38  ;;  %v1251_v31 = vmul.f32 0.5, %v1187_v36  ;;  %v1121_v21 = vadd.f32 %v1120_v26, %v1104_v18 }
  0xd5   :  { %v1105_v7 = vsub.f32 %v1057_v17, %v1089_v50  ;;  %v1234_v28 = vsub.f32 -0.9189385, %v1203_v25  ;;  %v1266_v37 = vmul.f32 %v1250_v56, %v1186_v10 }
  0xd6   :  { %v1235_v40 = vsub.f32 -0.9189385, %v1205_v29  ;;  %v1267_v42 = vmul.f32 %v1251_v31, %v1187_v36 }
  0xd7   :  { %v1282_v63 = vsub.f32 %v1234_v28, %v1266_v37  ;;  %v1122_v33 = vadd.f32 %v1120_v26, %v1105_v7 }
  0xd8   :  { %v1283_v51 = vsub.f32 %v1235_v40, %v1267_v42 }
  0xd9   :  { %v1299_v2 = vadd.f32 %v1298_v34, %v1282_v63  ;;  %v2243_v63 = vld [vmem:[%s3124_s4] ss:$0 sm:$0xff] }
  0xda   :  { %v1300_v0 = vadd.f32 %v1298_v34, %v1283_v51 }
  0xdb   :  { %v1331_v46 = vsub.f32 %v1121_v21, %v1299_v2  ;;  %v1315_v48 = vmax.f32 %v1121_v21, %v1299_v2  ;;  %v1363_v44 = vadd.f32 %v1299_v2, %v1121_v21 }
  0xdc   :  { %v1332_v3 = vsub.f32 %v1122_v33, %v1300_v0  ;;  %v1316_v27 = vmax.f32 %v1122_v33, %v1300_v0  ;;  %v1364_v59 = vadd.f32 %v1300_v0, %v1122_v33 }
  0xdd   :  { %v1379_v35 = vand.u32 2147483647, %v1331_v46  ;;  %vm1347_vm6 = vcmp.ne.f32.partialorder %v1331_v46, %v1331_v46 }
  0xde   :  { %v1380_v45 = vand.u32 2147483647, %v1332_v3  ;;  %vm1348_vm7 = vcmp.ne.f32.partialorder %v1332_v3, %v1332_v3 }
  0xdf   :  { %v1395_v47 = vsub.f32 0.0, %v1379_v35 }
  0xe0   :  { %v1396_v49 = vsub.f32 0.0, %v1380_v45 }
  0xe1   :  { %v1411_v20 = vmul.f32 1.442695, %v1395_v47 }
  0xe2   :  { %v1413_v41 = vmul.f32 1.442695, %v1396_v49 }
  0xe3   :  { %2396 = vpow2.f32 %v1411_v20 }
  0xe4   :  { %2398 = vpow2.f32 %v1413_v41 }
  0xed   :  { %v2397_v6 = vpop.eup %2396 }
  0xee   :  { %v2399_v52 = vpop.eup %2398  ;;  %v1443_v55 = vadd.f32 1.0, %v2397_v6  ;;  %v1446_v58 = vmul.f32 -0.5, %v2397_v6  ;;  %v1449_v43 = vand.u32 2147483647, %v2397_v6 }
  0xef   :  { %v1452_v57 = vadd.f32 1.0, %v2399_v52  ;;  %v1455_v60 = vmul.f32 -0.5, %v2399_v52  ;;  %v1458_v61 = vand.u32 2147483647, %v2399_v52 }
  0xf0   :  { %2400 = vlog2.f32 %v1443_v55  ;;  %v1447_v39 = vadd.f32 1.0, %v1446_v58  ;;  %vm1450_vm4 = vcmp.lt.f32.partialorder %v1449_v43, 0.0004427343 }
  0xf1   :  { %2402 = vlog2.f32 %v1452_v57  ;;  %v1456_v32 = vadd.f32 1.0, %v1455_v60  ;;  %vm1459_vm5 = vcmp.lt.f32.partialorder %v1458_v61, 0.0004427343 }
  0xf2   :  { %v1448_v5 = vmul.f32 %v2397_v6, %v1447_v39 }
  0xf3   :  { %v1457_v16 = vmul.f32 %v2399_v52, %v1456_v32 }
  0xfa   :  { %v2401_v62 = vpop.eup %2400 }
  0xfb   :  { %v2403_v1 = vpop.eup %2402  ;;  %v1445_v53 = vmul.f32 0.6931472, %v2401_v62 }
  0xfc   :  { %v1454_v4 = vmul.f32 0.6931472, %v2403_v1 }
  0xfd   :  { %v1451_v8 = vsel %vm1450_vm4, %v1448_v5, %v1445_v53 }
  0xfe   :  { %v1460_v9 = vsel %vm1459_vm5, %v1457_v16, %v1454_v4  ;;  %v1587_v11 = vadd.f32 %v1451_v8, %v1315_v48 }
  0xff   :  { %v1588_v12 = vadd.f32 %v1460_v9, %v1316_v27 }
 0x100   :  { %v1603_v13 = vsel %vm1347_vm6, %v1363_v44, %v1587_v11 }
 0x101   :  { %v1604_v54 = vsel %vm1348_vm7, %v1364_v59, %v1588_v12  ;;  %v2104_v14 = vsel %vm2047_vm8, %v1603_v13, 0.0 }
 0x102   :  { %v2105_v15 = vsel %vm2047_vm8, %v1604_v54, 0.0 }
 0x103   :  { %v2120_v19 = vadd.f32 %v2105_v15, %v2104_v14 }
 0x105   :  { %2135 = vadd.xlane.f32.xlu1 %v2120_v19 }
 0x147   :  { %v308_v23 = vpop.xlane.xlu0 %307 }
 0x148   :  { %v309_v10 = vrot.slane %v308_v23, 4 }
 0x14a   :  { %v310_v24 = vadd.f32 %v309_v10, %v308_v23 }
 0x14c   :  { %v311_v17 = vrot.slane %v310_v24, 2 }
 0x14e   :  { %v312_v36 = vadd.f32 %v311_v17, %v310_v24 }
 0x14f   :  { %v2096_v38 = vpop.xlane.xlu1 %2095 }
 0x150   :  { %v2097_v50 = vrot.slane %v2096_v38, 4  ;;  %v313_v18 = vrot.slane %v312_v36, 1 }
 0x152   :  { %v2098_v25 = vadd.f32 %v2097_v50, %v2096_v38  ;;  %v314_v56 = vadd.f32 %v313_v18, %v312_v36 }
 0x153   :  { %v318_v26 = vpop.xlane.xlu0 %317 }
 0x154   :  { %v319_v29 = vrot.slane %v318_v26, 4  ;;  %v2099_v31 = vrot.slane %v2098_v25, 2  ;;  %2321 = vpush %v314_v56 }
 0x156   :  { %v320_v7 = vadd.f32 %v319_v29, %v318_v26  ;;  %v2100_v28 = vadd.f32 %v2099_v31, %v2098_v25 }
 0x158   :  { %v321_v30 = vrot.slane %v320_v7, 2  ;;  %v2101_v37 = vrot.slane %v2100_v28, 1 }
 0x15a   :  { %v322_v40 = vadd.f32 %v321_v30, %v320_v7  ;;  %v2102_v34 = vadd.f32 %v2101_v37, %v2100_v28 }
 0x15c   :  { %v323_v42 = vrot.slane %v322_v40, 1 }
 0x15e   :  { %v324_v21 = vadd.f32 %v323_v42, %v322_v40 }
 0x160   :  { %2323 = vpush %v324_v21 }
 0x161   :  { %2325 = vpush %v2102_v34 }
 0x17f   :  { %v233_v33 = vpop.f32.mrb[0].mxu0 }
 0x180   :  { %v237_v51 = vadd.f32 %v2243_v63, %v233_v33  ;;  %v2296_v2 = vpop.f32.mrb[1].mxu0 }
 0x182   :  { %238 = vst [vmem:[#allocation16] sm:$0xff] %v237_v51 }
 0x183   :  { %2579 = shalt.err (!%p2576_p7)
}
 0x184   :  { %s2580_s3 = scalar_lea.hbm %s3131_s11, 128 }
 0x185   :  { %p2581_p8 = scmp.ne.s32.totalorder %s3131_s11, %s2580_s3  ;;  %p2584_p9 = scmp.lt.u32.totalorder %s2580_s3, %s3131_s11 }
 0x187   :  { %p2586_p10 = pnand %p2584_p9, %p2581_p8 }
 0x189   :  { %2589 = shalt.err (!%p2586_p10)
}
 0x18a   :  { %2220 = dma.vmem_to_hbm [thread:$0]  %s2218_s7, 128, %s3131_s11, [#allocation6]   ;;  %v327_v0 = vshrl.u32 %v299_v22, 7  ;;  %v328_v3 = vld [vmem:[#allocation17] sm:$0x3] }
 0x18b   :  { %s2322_s27 = spop %2321  ;;  %s2640_s1 = smov [#allocation17]  }
 0x18c   :  { %v330_v46 = vstv %s2322_s27  ;;  %vm329_vm8 = vcmp.eq.s32.totalorder %v327_v0, 0  ;;  %s2227_s16 = sshll.u32 %s2640_s1, 4  ;;  %s2228_s16 = int_to_ptr.vmem [resolvable:$true] %s2227_s16 }
 0x18d   :  { %s2590_s6 = scalar_lea.vmem %s2228_s16, 32  ;;  %p2595_p12 = scmp.lt.s32.totalorder %s2228_s16, %s2228_s16 }
 0x18e   :  { %p2591_p11 = scmp.ne.s32.totalorder %s2228_s16, %s2590_s6  ;;  %p2596_p13 = scmp.lt.s32.totalorder %s2590_s6, %s2590_s6 }
 0x190   :  { %p2597_p0 = por %p2596_p13, %p2595_p12 }
 0x191   :  { %s2324_s15 = spop %2323 }
 0x192   :  { %v2136_v35 = vpop.xlane.xlu1 %2135  ;;  %v331_v45 = vstv %s2324_s15  ;;  %s2326_s11 = spop %2325  ;;  %p2598_p1 = pnand %p2597_p0, %p2591_p11 }
 0x193   :  { %v2137_v47 = vrot.slane %v2136_v35, 4  ;;  %v332_v49 = vsel %vm329_vm8, %v330_v46, %v331_v45  ;;  %v2146_v22 = vstv %s2326_s11 }
 0x194   :  { %v333_v20 = vadd.f32 %v332_v49, %v328_v3 }
 0x195   :  { %v2138_v41 = vadd.f32 %v2137_v47, %v2136_v35 }
 0x196   :  { %334 = vst [vmem:[#allocation17] sm:$0x3] %v333_v20 }
 0x197   :  { %v2139_v6 = vrot.slane %v2138_v41, 2 }
 0x199   :  { %v2140_v52 = vadd.f32 %v2139_v6, %v2138_v41 }
 0x19b   :  { %v2141_v55 = vrot.slane %v2140_v52, 1 }
 0x19d   :  { %v2142_v57 = vadd.f32 %v2141_v55, %v2140_v52  ;;  %v2144_v60 = vld [vmem:[#allocation17] sm:$0x3] }
 0x19f   :  { %2327 = vpush %v2142_v57 }
 0x1d0   :  { %s2328_s17 = spop %2327 }
 0x1d1   :  { %v2147_v58 = vstv %s2328_s17 }
 0x1d2   :  { %v2148_v39 = vsel %vm329_vm8, %v2146_v22, %v2147_v58 }
 0x1d3   :  { %v2149_v43 = vadd.f32 %v2148_v39, %v2144_v60 }
 0x1d5   :  { %2150 = vst [vmem:[#allocation17] sm:$0x3] %v2149_v43 }
 0x1d6   :  { %2601 = shalt.err (!%p2598_p1)
}
 0x1d7   :  { %s2602_s22 = scalar_lea.hbm %s3132_s12, 32 }
 0x1d8   :  { %p2603_p2 = scmp.ne.s32.totalorder %s3132_s12, %s2602_s22  ;;  %p2606_p3 = scmp.lt.u32.totalorder %s2602_s22, %s3132_s12 }
 0x1da   :  { %p2608_p4 = pnand %p2606_p3, %p2603_p2 }
 0x1dc   :  { %2611 = shalt.err (!%p2608_p4)
}
 0x1dd   :  { %2230 = dma.vmem_to_hbm [thread:$0]  %s2228_s16, 32, %s3132_s12, [#allocation18]  }
 0x1de   :  { %2622 = dma.done.wait [#allocation6], 128  }
 0x1df   :  { %2623 = vsyncadd [#allocation6], 4294967168 }
 0x1e0   :  { %2624 = dma.done.wait [#allocation18], 32  }
 0x1e1   :  { %2625 = vsyncadd [#allocation18], 4294967264 }
 0x1e2   :  { %2237 = vsyncpa [#allocation5], 1 }
 0x1e3   :  { %2238 = vsyncpa [#allocation8], 1 }
 0x1e4   :  { %2239 = vsyncpa [#allocation11], 1 }
 0x1e5   :  { %2240 = vsyncpa [#allocation14], 1 }
 0x1e6   :  { %2241 = vsyncpa [#allocation6], 1 }
 0x1e7   :  { %2242 = vsyncpa [#allocation18], 1 }

</bundles_post_ra>
